<compile_context>
chip_gen: v6e
topology: v6e:2x2x1
jax: 0.10.0
libtpu: 0.0.40
codegen_flags: <defaults>
</compile_context>

<pallas_src>
import functools

import jax
import jax.numpy as jnp
import numpy as np
from jax.experimental import pallas as pl
from jax.experimental.pallas import tpu as pltpu

ALPHA = 0.25
GAMMA = 2.0


def _pow(x, g):
    """x ** g, matching torch.pow for integral float exponents (e.g. gamma=2.0)."""
    gf = float(g)
    if gf.is_integer() and gf >= 0:
        n = int(gf)
        if n == 0:
            return jnp.ones_like(x)
        out = x
        for _ in range(n - 1):
            out = out * x
        return out
    # NOTE: only valid for x > 0 (non-integer gamma on raw logits can NaN — mirrors the
    # quirk of the reference module, which raises raw logits to the power gamma).
    return jnp.exp(gf * jnp.log(x))


def _pick_tile(n, max_tile=2048):
    """Largest lane-dense N-tile (multiple of 128) that divides n, capped at max_tile.

    Cap chosen so double-buffered tiles fit comfortably in v7x's smaller (64 MiB physical /
    32 MiB default-scoped) VMEM as well as v5e/v6e.
    """
    if n <= max_tile:
        return n
    t = (max_tile // 128) * 128
    while t >= 128:
        if n % t == 0:
            return t
        t -= 128
    return n  # fallback: single full-width tile


def _focal_loss_kernel(cls_ref, reg_ref, anc_ref, gt_ref,
                       cls_out_ref, reg_out_ref, *, alpha, gamma, num_gt):
    # cls_ref: (1, C, T) logits   reg_ref: (1, 4, T)   anc_ref: (4, T)
    # gt_ref : SMEM (B, 4*M) flat (xmin, ymin, xmax, ymax) per gt box
    # cls_out_ref: (1, C, T)      reg_out_ref: (1, 1, T) per-anchor masked smooth-L1
    b = pl.program_id(0)
    T = anc_ref.shape[1]

    # ---------------- anchor-side quantities (hoisted, reused for IoU + encode) -------
    ax1 = anc_ref[0:1, :]
    ay1 = anc_ref[1:2, :]
    ax2 = anc_ref[2:3, :]
    ay2 = anc_ref[3:4, :]

    aw = ax2 - ax1                       # (1, T)
    ah = ay2 - ay1
    acx = ax1 + 0.5 * aw
    acy = ay1 + 0.5 * ah
    a_area = aw * ah
    inv_aw = pl.reciprocal(aw, approx=False)   # EUP, reused across gt boxes & batch
    inv_ah = pl.reciprocal(ah, approx=False)

    # ---------------- anchor <-> gt matching: unrolled loop over M gt boxes -----------
    # Running first-argmax via strict-> select (matches torch/jnp argmax tie behaviour).
    max_iou = jnp.full((1, T), -1.0, dtype=jnp.float32)
    zeros = jnp.zeros((1, T), dtype=jnp.float32)
    bgx1 = zeros
    bgy1 = zeros
    bgx2 = zeros
    bgy2 = zeros

    for m in range(num_gt):
        gx1 = gt_ref[b, 4 * m + 0]       # scalar loads from SMEM
        gy1 = gt_ref[b, 4 * m + 1]
        gx2 = gt_ref[b, 4 * m + 2]
        gy2 = gt_ref[b, 4 * m + 3]

        ix1 = jnp.maximum(ax1, gx1)
        iy1 = jnp.maximum(ay1, gy1)
        ix2 = jnp.minimum(ax2, gx2)
        iy2 = jnp.minimum(ay2, gy2)
        inter = jnp.maximum(ix2 - ix1, 0.0) * jnp.maximum(iy2 - iy1, 0.0)
        g_area = (gx2 - gx1) * (gy2 - gy1)                     # scalar
        union = jnp.maximum(a_area + g_area - inter, 1e-6)
        iou_m = inter * pl.reciprocal(union, approx=False)     # (1, T)

        better = iou_m > max_iou
        max_iou = jnp.where(better, iou_m, max_iou)
        bgx1 = jnp.where(better, gx1, bgx1)
        bgy1 = jnp.where(better, gy1, bgy1)
        bgx2 = jnp.where(better, gx2, bgx2)
        bgy2 = jnp.where(better, gy2, bgy2)

    pos_mask = max_iou > 0.5             # (1, T)
    # NOTE: neg_mask (< 0.4) is computed but unused in the reference module.

    # ---------------- focal classification loss (elementwise, no reduction) -----------
    cls = cls_ref[0]                     # (C, T)
    t = pos_mask.astype(jnp.float32)     # only materialized for the cls * t BCE term
    alpha_factor = jnp.where(pos_mask, alpha, 1.0 - alpha)        # (1, T)
    focal_weight = jnp.where(pos_mask, 1.0 - cls, cls)            # (C, T)
    focal_weight = alpha_factor * _pow(focal_weight, gamma)
    # numerically-stable BCE-with-logits (same value as torch's formulation)
    bce = (jnp.maximum(cls, 0.0) - cls * t
           + jnp.log(1.0 + jnp.exp(-jnp.abs(cls))))
    cls_out_ref[0] = (focal_weight * bce).astype(cls_out_ref.dtype)

    # ---------------- regression loss: per-anchor masked smooth-L1 --------------------
    pred = reg_ref[0]                    # (4, T)
    px = pred[0:1, :]
    py = pred[1:2, :]
    pw = pred[2:3, :]
    ph = pred[3:4, :]

    gw = bgx2 - bgx1
    gh = bgy2 - bgy1
    gcx = bgx1 + 0.5 * gw
    gcy = bgy1 + 0.5 * gh

    dx = (gcx - acx) * inv_aw
    dy = (gcy - acy) * inv_ah
    dw = jnp.log(jnp.where(pos_mask, gw * inv_aw, 1.0))   # guard log() for masked anchors
    dh = jnp.log(jnp.where(pos_mask, gh * inv_ah, 1.0))

    def smooth_l1(d):                    # beta = 1.0 (torch default)
        ad = jnp.abs(d)
        return jnp.where(ad < 1.0, 0.5 * d * d, ad - 0.5)

    per_anchor = (smooth_l1(px - dx) + smooth_l1(py - dy)
                  + smooth_l1(pw - dw) + smooth_l1(ph - dh))      # (1, T)
    reg_out_ref[0] = jnp.where(pos_mask, per_anchor, 0.0)         # lane-dense store


def focal_loss_pallas(cls_preds, reg_preds, anchors, gt_boxes,
                      alpha=ALPHA, gamma=GAMMA):
    B, N, C = cls_preds.shape
    M = gt_boxes.shape[1]

    # Wrapper-side re-layout: put N on the lane axis.
    cls_t = jnp.transpose(cls_preds.astype(jnp.float32), (0, 2, 1))      # (B, C, N)
    reg_t = jnp.transpose(reg_preds.astype(jnp.float32), (0, 2, 1))      # (B, 4, N)
    anc_t = jnp.transpose(anchors[0].astype(jnp.float32), (1, 0))        # (4, N)
    gt_f = gt_boxes[..., :4].astype(jnp.float32).reshape(B, 4 * M)       # (B, 4M) -> SMEM

    tile_n = _pick_tile(N)
    grid = (B, N // tile_n)

    kernel = functools.partial(_focal_loss_kernel, alpha=alpha, gamma=gamma, num_gt=M)
    cls_loss_t, reg_per_anchor = pl.pallas_call(
        kernel,
        out_shape=(jax.ShapeDtypeStruct((B, C, N), jnp.float32),
                   jax.ShapeDtypeStruct((B, 1, N), jnp.float32)),
        grid=grid,
        in_specs=[
            pl.BlockSpec((1, C, tile_n), lambda b, n: (b, 0, n)),
            pl.BlockSpec((1, 4, tile_n), lambda b, n: (b, 0, n)),
            pl.BlockSpec((4, tile_n), lambda b, n: (0, n)),
            pl.BlockSpec(memory_space=pltpu.MemorySpace.SMEM),   # gt boxes, untiled scalars
        ],
        out_specs=(
            pl.BlockSpec((1, C, tile_n), lambda b, n: (b, 0, n)),
            pl.BlockSpec((1, 1, tile_n), lambda b, n: (b, 0, n)),
        ),
        compiler_params=pltpu.CompilerParams(
            dimension_semantics=("parallel", "parallel")),   # disjoint outputs per cell
    )(cls_t, reg_t, anc_t, gt_f)

    cls_loss = jnp.transpose(cls_loss_t, (0, 2, 1))                       # (B, N, C)
    reg_loss = jnp.sum(reg_per_anchor) / B                                # scalar / batch
    return cls_loss, reg_loss


def focal_loss_ref(cls_preds, reg_preds, anchors, gt_boxes,
                   alpha=ALPHA, gamma=GAMMA):
    """Pure-JAX mirror of the PyTorch module (for validation)."""
    B, N, C = cls_preds.shape
    a = anchors[0]                                    # (N, 4)
    g = gt_boxes[..., :4]                             # (B, M, 4)
    ix1 = jnp.maximum(a[None, :, None, 0], g[:, None, :, 0])
    iy1 = jnp.maximum(a[None, :, None, 1], g[:, None, :, 1])
    ix2 = jnp.minimum(a[None, :, None, 2], g[:, None, :, 2])
    iy2 = jnp.minimum(a[None, :, None, 3], g[:, None, :, 3])
    iw = jnp.maximum(ix2 - ix1, 0.0)
    ih = jnp.maximum(iy2 - iy1, 0.0)
    inter = iw * ih
    a_area = ((a[:, 2] - a[:, 0]) * (a[:, 3] - a[:, 1]))[None, :, None]
    g_area = ((g[..., 2] - g[..., 0]) * (g[..., 3] - g[..., 1]))[:, None, :]
    iou = inter / jnp.maximum(a_area + g_area - inter, 1e-6)

    max_ious = jnp.max(iou, axis=2)
    max_ids = jnp.argmax(iou, axis=2)
    pos_mask = max_ious > 0.5
    assigned = jnp.take_along_axis(gt_boxes, max_ids[:, :, None], axis=1)[..., :4]

    awh = a[:, 2:] - a[:, :2]
    actr = a[:, :2] + 0.5 * awh
    gwh = assigned[..., 2:] - assigned[..., :2]
    gctr = assigned[..., :2] + 0.5 * gwh
    dctr = (gctr - actr[None]) / awh[None]
    dwh = jnp.log(jnp.where(pos_mask[..., None], gwh / awh[None], 1.0))
    reg_t = jnp.concatenate([dctr, dwh], axis=-1)

    t = pos_mask[:, :, None].astype(cls_preds.dtype)
    alpha_f = jnp.where(t == 1.0, alpha, 1.0 - alpha)
    fw = jnp.where(t == 1.0, 1.0 - cls_preds, cls_preds)
    fw = alpha_f * _pow(fw, gamma)
    bce = (jnp.maximum(cls_preds, 0.0) - cls_preds * t
           + jnp.log(1.0 + jnp.exp(-jnp.abs(cls_preds))))
    cls_loss = fw * bce

    d = reg_preds - reg_t
    sl = jnp.where(jnp.abs(d) < 1.0, 0.5 * d * d, jnp.abs(d) - 0.5)
    reg_loss = jnp.sum(jnp.where(pos_mask[..., None], sl, 0.0)) / B
    return cls_loss, reg_loss


if __name__ == "__main__":
    key = jax.random.PRNGKey(0)
    k_idx, k_jit, k_cls, k_reg = jax.random.split(key, 4)

    B, C, M = 2, 4, 8
    S = 16
    N = S * S                                          # 256 anchors

    # Anchors: one 2x2 anchor per cell of a 16x16 grid.
    ys, xs = jnp.meshgrid(jnp.arange(S, dtype=jnp.float32) + 0.5,
                          jnp.arange(S, dtype=jnp.float32) + 0.5, indexing="ij")
    ctrs = jnp.stack([xs.reshape(-1), ys.reshape(-1)], axis=-1)       # (N, 2)
    half = 1.0
    anchors = jnp.concatenate([ctrs - half, ctrs + half], axis=-1)[None]  # (1, N, 4)

    # GT boxes: 2x2 boxes jittered around randomly chosen anchor centers,
    # so some anchors have IoU > 0.5 (positives exist).
    gt_idx = jax.random.randint(k_idx, (B, M), 0, N)
    gt_ctr = ctrs[gt_idx] + jax.random.uniform(k_jit, (B, M, 2),
                                               minval=-0.2, maxval=0.2)
    gt_boxes = jnp.concatenate([gt_ctr - half, gt_ctr + half], axis=-1)   # (B, M, 4)

    cls_preds = jax.random.normal(k_cls, (B, N, C), dtype=jnp.float32)
    reg_preds = 0.1 * jax.random.normal(k_reg, (B, N, 4), dtype=jnp.float32)

    cls_loss, reg_loss = focal_loss_pallas(cls_preds, reg_preds, anchors, gt_boxes)
    jax.block_until_ready((cls_loss, reg_loss))

    cls_ref, reg_ref = focal_loss_ref(cls_preds, reg_preds, anchors, gt_boxes)
    np.testing.assert_allclose(np.asarray(cls_loss), np.asarray(cls_ref),
                               rtol=1e-4, atol=1e-4)
    np.testing.assert_allclose(np.asarray(reg_loss), np.asarray(reg_ref),
                               rtol=1e-4, atol=1e-4)

    print("KERNEL_OK")
</pallas_src>

<mosaic_0001>
module attributes {stable_mosaic.version = 11 : i64} {
  func.func @_focal_loss_kernel(%arg0: i32, %arg1: i32, %arg2: memref<1x4x256xf32, #tpu.memory_space<vmem>>, %arg3: memref<1x4x256xf32, #tpu.memory_space<vmem>>, %arg4: memref<4x256xf32, #tpu.memory_space<vmem>>, %arg5: memref<2x32xf32, #tpu.memory_space<smem>>, %arg6: memref<1x4x256xf32, #tpu.memory_space<vmem>>, %arg7: memref<1x1x256xf32, #tpu.memory_space<vmem>>) attributes {dimension_semantics = [#tpu.dimension_semantics<parallel>, #tpu.dimension_semantics<parallel>], iteration_bounds = array<i64: 2, 1>, scalar_prefetch = 0 : i64, scratch_operands = 0 : i64, tpu.core_type = #tpu.core_type<tc>, window_params = [{transform_indices = @transform_0, window_bounds = array<i64: 1, 4, 256>}, {transform_indices = @transform_1, window_bounds = array<i64: 1, 4, 256>}, {transform_indices = @transform_2, window_bounds = array<i64: 4, 256>}, {transform_indices = @transform_3, window_bounds = array<i64: 2, 32>}, {transform_indices = @transform_4, window_bounds = array<i64: 1, 4, 256>}, {transform_indices = @transform_5, window_bounds = array<i64: 1, 1, 256>}]} {
    %c0 = arith.constant 0 : index
    %c0_0 = arith.constant 0 : index
    %0 = vector.load %arg4[%c0, %c0_0] : memref<4x256xf32, #tpu.memory_space<vmem>>, vector<1x256xf32>
    %c1 = arith.constant 1 : index
    %c0_1 = arith.constant 0 : index
    %1 = vector.load %arg4[%c1, %c0_1] : memref<4x256xf32, #tpu.memory_space<vmem>>, vector<1x256xf32>
    %c2 = arith.constant 2 : index
    %c0_2 = arith.constant 0 : index
    %2 = vector.load %arg4[%c2, %c0_2] : memref<4x256xf32, #tpu.memory_space<vmem>>, vector<1x256xf32>
    %c3 = arith.constant 3 : index
    %c0_3 = arith.constant 0 : index
    %3 = vector.load %arg4[%c3, %c0_3] : memref<4x256xf32, #tpu.memory_space<vmem>>, vector<1x256xf32>
    %4 = arith.subf %2, %0 : vector<1x256xf32>
    %5 = arith.subf %3, %1 : vector<1x256xf32>
    %cst = arith.constant 5.000000e-01 : f32
    %6 = vector.broadcast %cst : f32 to vector<1x256xf32>
    %7 = arith.mulf %6, %4 : vector<1x256xf32>
    %8 = arith.addf %0, %7 : vector<1x256xf32>
    %cst_4 = arith.constant 5.000000e-01 : f32
    %9 = vector.broadcast %cst_4 : f32 to vector<1x256xf32>
    %10 = arith.mulf %9, %5 : vector<1x256xf32>
    %11 = arith.addf %1, %10 : vector<1x256xf32>
    %12 = arith.mulf %4, %5 : vector<1x256xf32>
    %13 = tpu.reciprocal %4 : vector<1x256xf32> -> vector<1x256xf32>
    %14 = tpu.reciprocal %5 : vector<1x256xf32> -> vector<1x256xf32>
    %cst_5 = arith.constant -1.000000e+00 : f32
    %15 = vector.broadcast %cst_5 : f32 to vector<1x256xf32>
    %cst_6 = arith.constant 0.000000e+00 : f32
    %16 = vector.broadcast %cst_6 : f32 to vector<1x256xf32>
    %17 = arith.index_cast %arg0 : i32 to index
    %c0_7 = arith.constant 0 : index
    %18 = memref.load %arg5[%17, %c0_7] : memref<2x32xf32, #tpu.memory_space<smem>>
    %19 = arith.index_cast %arg0 : i32 to index
    %c1_8 = arith.constant 1 : index
    %20 = memref.load %arg5[%19, %c1_8] : memref<2x32xf32, #tpu.memory_space<smem>>
    %21 = arith.index_cast %arg0 : i32 to index
    %c2_9 = arith.constant 2 : index
    %22 = memref.load %arg5[%21, %c2_9] : memref<2x32xf32, #tpu.memory_space<smem>>
    %23 = arith.index_cast %arg0 : i32 to index
    %c3_10 = arith.constant 3 : index
    %24 = memref.load %arg5[%23, %c3_10] : memref<2x32xf32, #tpu.memory_space<smem>>
    %25 = vector.broadcast %18 : f32 to vector<1x256xf32>
    %26 = arith.maximumf %0, %25 : vector<1x256xf32>
    %27 = vector.broadcast %20 : f32 to vector<1x256xf32>
    %28 = arith.maximumf %1, %27 : vector<1x256xf32>
    %29 = vector.broadcast %22 : f32 to vector<1x256xf32>
    %30 = arith.minimumf %2, %29 : vector<1x256xf32>
    %31 = vector.broadcast %24 : f32 to vector<1x256xf32>
    %32 = arith.minimumf %3, %31 : vector<1x256xf32>
    %33 = arith.subf %30, %26 : vector<1x256xf32>
    %cst_11 = arith.constant 0.000000e+00 : f32
    %34 = vector.broadcast %cst_11 : f32 to vector<1x256xf32>
    %35 = arith.maximumf %33, %34 : vector<1x256xf32>
    %36 = arith.subf %32, %28 : vector<1x256xf32>
    %cst_12 = arith.constant 0.000000e+00 : f32
    %37 = vector.broadcast %cst_12 : f32 to vector<1x256xf32>
    %38 = arith.maximumf %36, %37 : vector<1x256xf32>
    %39 = arith.mulf %35, %38 : vector<1x256xf32>
    %40 = arith.subf %22, %18 : f32
    %41 = arith.subf %24, %20 : f32
    %42 = arith.mulf %40, %41 : f32
    %43 = vector.broadcast %42 : f32 to vector<1x256xf32>
    %44 = arith.addf %12, %43 : vector<1x256xf32>
    %45 = arith.subf %44, %39 : vector<1x256xf32>
    %cst_13 = arith.constant 9.99999997E-7 : f32
    %46 = vector.broadcast %cst_13 : f32 to vector<1x256xf32>
    %47 = arith.maximumf %45, %46 : vector<1x256xf32>
    %48 = tpu.reciprocal %47 : vector<1x256xf32> -> vector<1x256xf32>
    %49 = arith.mulf %39, %48 : vector<1x256xf32>
    %50 = arith.cmpf ogt, %49, %15 : vector<1x256xf32>
    %51 = arith.select %50, %49, %15 : vector<1x256xi1>, vector<1x256xf32>
    %52 = vector.broadcast %18 : f32 to vector<1x256xf32>
    %53 = arith.select %50, %52, %16 : vector<1x256xi1>, vector<1x256xf32>
    %54 = vector.broadcast %20 : f32 to vector<1x256xf32>
    %55 = arith.select %50, %54, %16 : vector<1x256xi1>, vector<1x256xf32>
    %56 = vector.broadcast %22 : f32 to vector<1x256xf32>
    %57 = arith.select %50, %56, %16 : vector<1x256xi1>, vector<1x256xf32>
    %58 = vector.broadcast %24 : f32 to vector<1x256xf32>
    %59 = arith.select %50, %58, %16 : vector<1x256xi1>, vector<1x256xf32>
    %60 = arith.index_cast %arg0 : i32 to index
    %c4 = arith.constant 4 : index
    %61 = memref.load %arg5[%60, %c4] : memref<2x32xf32, #tpu.memory_space<smem>>
    %62 = arith.index_cast %arg0 : i32 to index
    %c5 = arith.constant 5 : index
    %63 = memref.load %arg5[%62, %c5] : memref<2x32xf32, #tpu.memory_space<smem>>
    %64 = arith.index_cast %arg0 : i32 to index
    %c6 = arith.constant 6 : index
    %65 = memref.load %arg5[%64, %c6] : memref<2x32xf32, #tpu.memory_space<smem>>
    %66 = arith.index_cast %arg0 : i32 to index
    %c7 = arith.constant 7 : index
    %67 = memref.load %arg5[%66, %c7] : memref<2x32xf32, #tpu.memory_space<smem>>
    %68 = vector.broadcast %61 : f32 to vector<1x256xf32>
    %69 = arith.maximumf %0, %68 : vector<1x256xf32>
    %70 = vector.broadcast %63 : f32 to vector<1x256xf32>
    %71 = arith.maximumf %1, %70 : vector<1x256xf32>
    %72 = vector.broadcast %65 : f32 to vector<1x256xf32>
    %73 = arith.minimumf %2, %72 : vector<1x256xf32>
    %74 = vector.broadcast %67 : f32 to vector<1x256xf32>
    %75 = arith.minimumf %3, %74 : vector<1x256xf32>
    %76 = arith.subf %73, %69 : vector<1x256xf32>
    %cst_14 = arith.constant 0.000000e+00 : f32
    %77 = vector.broadcast %cst_14 : f32 to vector<1x256xf32>
    %78 = arith.maximumf %76, %77 : vector<1x256xf32>
    %79 = arith.subf %75, %71 : vector<1x256xf32>
    %cst_15 = arith.constant 0.000000e+00 : f32
    %80 = vector.broadcast %cst_15 : f32 to vector<1x256xf32>
    %81 = arith.maximumf %79, %80 : vector<1x256xf32>
    %82 = arith.mulf %78, %81 : vector<1x256xf32>
    %83 = arith.subf %65, %61 : f32
    %84 = arith.subf %67, %63 : f32
    %85 = arith.mulf %83, %84 : f32
    %86 = vector.broadcast %85 : f32 to vector<1x256xf32>
    %87 = arith.addf %12, %86 : vector<1x256xf32>
    %88 = arith.subf %87, %82 : vector<1x256xf32>
    %cst_16 = arith.constant 9.99999997E-7 : f32
    %89 = vector.broadcast %cst_16 : f32 to vector<1x256xf32>
    %90 = arith.maximumf %88, %89 : vector<1x256xf32>
    %91 = tpu.reciprocal %90 : vector<1x256xf32> -> vector<1x256xf32>
    %92 = arith.mulf %82, %91 : vector<1x256xf32>
    %93 = arith.cmpf ogt, %92, %51 : vector<1x256xf32>
    %94 = arith.select %93, %92, %51 : vector<1x256xi1>, vector<1x256xf32>
    %95 = vector.broadcast %61 : f32 to vector<1x256xf32>
    %96 = arith.select %93, %95, %53 : vector<1x256xi1>, vector<1x256xf32>
    %97 = vector.broadcast %63 : f32 to vector<1x256xf32>
    %98 = arith.select %93, %97, %55 : vector<1x256xi1>, vector<1x256xf32>
    %99 = vector.broadcast %65 : f32 to vector<1x256xf32>
    %100 = arith.select %93, %99, %57 : vector<1x256xi1>, vector<1x256xf32>
    %101 = vector.broadcast %67 : f32 to vector<1x256xf32>
    %102 = arith.select %93, %101, %59 : vector<1x256xi1>, vector<1x256xf32>
    %103 = arith.index_cast %arg0 : i32 to index
    %c8 = arith.constant 8 : index
    %104 = memref.load %arg5[%103, %c8] : memref<2x32xf32, #tpu.memory_space<smem>>
    %105 = arith.index_cast %arg0 : i32 to index
    %c9 = arith.constant 9 : index
    %106 = memref.load %arg5[%105, %c9] : memref<2x32xf32, #tpu.memory_space<smem>>
    %107 = arith.index_cast %arg0 : i32 to index
    %c10 = arith.constant 10 : index
    %108 = memref.load %arg5[%107, %c10] : memref<2x32xf32, #tpu.memory_space<smem>>
    %109 = arith.index_cast %arg0 : i32 to index
    %c11 = arith.constant 11 : index
    %110 = memref.load %arg5[%109, %c11] : memref<2x32xf32, #tpu.memory_space<smem>>
    %111 = vector.broadcast %104 : f32 to vector<1x256xf32>
    %112 = arith.maximumf %0, %111 : vector<1x256xf32>
    %113 = vector.broadcast %106 : f32 to vector<1x256xf32>
    %114 = arith.maximumf %1, %113 : vector<1x256xf32>
    %115 = vector.broadcast %108 : f32 to vector<1x256xf32>
    %116 = arith.minimumf %2, %115 : vector<1x256xf32>
    %117 = vector.broadcast %110 : f32 to vector<1x256xf32>
    %118 = arith.minimumf %3, %117 : vector<1x256xf32>
    %119 = arith.subf %116, %112 : vector<1x256xf32>
    %cst_17 = arith.constant 0.000000e+00 : f32
    %120 = vector.broadcast %cst_17 : f32 to vector<1x256xf32>
    %121 = arith.maximumf %119, %120 : vector<1x256xf32>
    %122 = arith.subf %118, %114 : vector<1x256xf32>
    %cst_18 = arith.constant 0.000000e+00 : f32
    %123 = vector.broadcast %cst_18 : f32 to vector<1x256xf32>
    %124 = arith.maximumf %122, %123 : vector<1x256xf32>
    %125 = arith.mulf %121, %124 : vector<1x256xf32>
    %126 = arith.subf %108, %104 : f32
    %127 = arith.subf %110, %106 : f32
    %128 = arith.mulf %126, %127 : f32
    %129 = vector.broadcast %128 : f32 to vector<1x256xf32>
    %130 = arith.addf %12, %129 : vector<1x256xf32>
    %131 = arith.subf %130, %125 : vector<1x256xf32>
    %cst_19 = arith.constant 9.99999997E-7 : f32
    %132 = vector.broadcast %cst_19 : f32 to vector<1x256xf32>
    %133 = arith.maximumf %131, %132 : vector<1x256xf32>
    %134 = tpu.reciprocal %133 : vector<1x256xf32> -> vector<1x256xf32>
    %135 = arith.mulf %125, %134 : vector<1x256xf32>
    %136 = arith.cmpf ogt, %135, %94 : vector<1x256xf32>
    %137 = arith.select %136, %135, %94 : vector<1x256xi1>, vector<1x256xf32>
    %138 = vector.broadcast %104 : f32 to vector<1x256xf32>
    %139 = arith.select %136, %138, %96 : vector<1x256xi1>, vector<1x256xf32>
    %140 = vector.broadcast %106 : f32 to vector<1x256xf32>
    %141 = arith.select %136, %140, %98 : vector<1x256xi1>, vector<1x256xf32>
    %142 = vector.broadcast %108 : f32 to vector<1x256xf32>
    %143 = arith.select %136, %142, %100 : vector<1x256xi1>, vector<1x256xf32>
    %144 = vector.broadcast %110 : f32 to vector<1x256xf32>
    %145 = arith.select %136, %144, %102 : vector<1x256xi1>, vector<1x256xf32>
    %146 = arith.index_cast %arg0 : i32 to index
    %c12 = arith.constant 12 : index
    %147 = memref.load %arg5[%146, %c12] : memref<2x32xf32, #tpu.memory_space<smem>>
    %148 = arith.index_cast %arg0 : i32 to index
    %c13 = arith.constant 13 : index
    %149 = memref.load %arg5[%148, %c13] : memref<2x32xf32, #tpu.memory_space<smem>>
    %150 = arith.index_cast %arg0 : i32 to index
    %c14 = arith.constant 14 : index
    %151 = memref.load %arg5[%150, %c14] : memref<2x32xf32, #tpu.memory_space<smem>>
    %152 = arith.index_cast %arg0 : i32 to index
    %c15 = arith.constant 15 : index
    %153 = memref.load %arg5[%152, %c15] : memref<2x32xf32, #tpu.memory_space<smem>>
    %154 = vector.broadcast %147 : f32 to vector<1x256xf32>
    %155 = arith.maximumf %0, %154 : vector<1x256xf32>
    %156 = vector.broadcast %149 : f32 to vector<1x256xf32>
    %157 = arith.maximumf %1, %156 : vector<1x256xf32>
    %158 = vector.broadcast %151 : f32 to vector<1x256xf32>
    %159 = arith.minimumf %2, %158 : vector<1x256xf32>
    %160 = vector.broadcast %153 : f32 to vector<1x256xf32>
    %161 = arith.minimumf %3, %160 : vector<1x256xf32>
    %162 = arith.subf %159, %155 : vector<1x256xf32>
    %cst_20 = arith.constant 0.000000e+00 : f32
    %163 = vector.broadcast %cst_20 : f32 to vector<1x256xf32>
    %164 = arith.maximumf %162, %163 : vector<1x256xf32>
    %165 = arith.subf %161, %157 : vector<1x256xf32>
    %cst_21 = arith.constant 0.000000e+00 : f32
    %166 = vector.broadcast %cst_21 : f32 to vector<1x256xf32>
    %167 = arith.maximumf %165, %166 : vector<1x256xf32>
    %168 = arith.mulf %164, %167 : vector<1x256xf32>
    %169 = arith.subf %151, %147 : f32
    %170 = arith.subf %153, %149 : f32
    %171 = arith.mulf %169, %170 : f32
    %172 = vector.broadcast %171 : f32 to vector<1x256xf32>
    %173 = arith.addf %12, %172 : vector<1x256xf32>
    %174 = arith.subf %173, %168 : vector<1x256xf32>
    %cst_22 = arith.constant 9.99999997E-7 : f32
    %175 = vector.broadcast %cst_22 : f32 to vector<1x256xf32>
    %176 = arith.maximumf %174, %175 : vector<1x256xf32>
    %177 = tpu.reciprocal %176 : vector<1x256xf32> -> vector<1x256xf32>
    %178 = arith.mulf %168, %177 : vector<1x256xf32>
    %179 = arith.cmpf ogt, %178, %137 : vector<1x256xf32>
    %180 = arith.select %179, %178, %137 : vector<1x256xi1>, vector<1x256xf32>
    %181 = vector.broadcast %147 : f32 to vector<1x256xf32>
    %182 = arith.select %179, %181, %139 : vector<1x256xi1>, vector<1x256xf32>
    %183 = vector.broadcast %149 : f32 to vector<1x256xf32>
    %184 = arith.select %179, %183, %141 : vector<1x256xi1>, vector<1x256xf32>
    %185 = vector.broadcast %151 : f32 to vector<1x256xf32>
    %186 = arith.select %179, %185, %143 : vector<1x256xi1>, vector<1x256xf32>
    %187 = vector.broadcast %153 : f32 to vector<1x256xf32>
    %188 = arith.select %179, %187, %145 : vector<1x256xi1>, vector<1x256xf32>
    %189 = arith.index_cast %arg0 : i32 to index
    %c16 = arith.constant 16 : index
    %190 = memref.load %arg5[%189, %c16] : memref<2x32xf32, #tpu.memory_space<smem>>
    %191 = arith.index_cast %arg0 : i32 to index
    %c17 = arith.constant 17 : index
    %192 = memref.load %arg5[%191, %c17] : memref<2x32xf32, #tpu.memory_space<smem>>
    %193 = arith.index_cast %arg0 : i32 to index
    %c18 = arith.constant 18 : index
    %194 = memref.load %arg5[%193, %c18] : memref<2x32xf32, #tpu.memory_space<smem>>
    %195 = arith.index_cast %arg0 : i32 to index
    %c19 = arith.constant 19 : index
    %196 = memref.load %arg5[%195, %c19] : memref<2x32xf32, #tpu.memory_space<smem>>
    %197 = vector.broadcast %190 : f32 to vector<1x256xf32>
    %198 = arith.maximumf %0, %197 : vector<1x256xf32>
    %199 = vector.broadcast %192 : f32 to vector<1x256xf32>
    %200 = arith.maximumf %1, %199 : vector<1x256xf32>
    %201 = vector.broadcast %194 : f32 to vector<1x256xf32>
    %202 = arith.minimumf %2, %201 : vector<1x256xf32>
    %203 = vector.broadcast %196 : f32 to vector<1x256xf32>
    %204 = arith.minimumf %3, %203 : vector<1x256xf32>
    %205 = arith.subf %202, %198 : vector<1x256xf32>
    %cst_23 = arith.constant 0.000000e+00 : f32
    %206 = vector.broadcast %cst_23 : f32 to vector<1x256xf32>
    %207 = arith.maximumf %205, %206 : vector<1x256xf32>
    %208 = arith.subf %204, %200 : vector<1x256xf32>
    %cst_24 = arith.constant 0.000000e+00 : f32
    %209 = vector.broadcast %cst_24 : f32 to vector<1x256xf32>
    %210 = arith.maximumf %208, %209 : vector<1x256xf32>
    %211 = arith.mulf %207, %210 : vector<1x256xf32>
    %212 = arith.subf %194, %190 : f32
    %213 = arith.subf %196, %192 : f32
    %214 = arith.mulf %212, %213 : f32
    %215 = vector.broadcast %214 : f32 to vector<1x256xf32>
    %216 = arith.addf %12, %215 : vector<1x256xf32>
    %217 = arith.subf %216, %211 : vector<1x256xf32>
    %cst_25 = arith.constant 9.99999997E-7 : f32
    %218 = vector.broadcast %cst_25 : f32 to vector<1x256xf32>
    %219 = arith.maximumf %217, %218 : vector<1x256xf32>
    %220 = tpu.reciprocal %219 : vector<1x256xf32> -> vector<1x256xf32>
    %221 = arith.mulf %211, %220 : vector<1x256xf32>
    %222 = arith.cmpf ogt, %221, %180 : vector<1x256xf32>
    %223 = arith.select %222, %221, %180 : vector<1x256xi1>, vector<1x256xf32>
    %224 = vector.broadcast %190 : f32 to vector<1x256xf32>
    %225 = arith.select %222, %224, %182 : vector<1x256xi1>, vector<1x256xf32>
    %226 = vector.broadcast %192 : f32 to vector<1x256xf32>
    %227 = arith.select %222, %226, %184 : vector<1x256xi1>, vector<1x256xf32>
    %228 = vector.broadcast %194 : f32 to vector<1x256xf32>
    %229 = arith.select %222, %228, %186 : vector<1x256xi1>, vector<1x256xf32>
    %230 = vector.broadcast %196 : f32 to vector<1x256xf32>
    %231 = arith.select %222, %230, %188 : vector<1x256xi1>, vector<1x256xf32>
    %232 = arith.index_cast %arg0 : i32 to index
    %c20 = arith.constant 20 : index
    %233 = memref.load %arg5[%232, %c20] : memref<2x32xf32, #tpu.memory_space<smem>>
    %234 = arith.index_cast %arg0 : i32 to index
    %c21 = arith.constant 21 : index
    %235 = memref.load %arg5[%234, %c21] : memref<2x32xf32, #tpu.memory_space<smem>>
    %236 = arith.index_cast %arg0 : i32 to index
    %c22 = arith.constant 22 : index
    %237 = memref.load %arg5[%236, %c22] : memref<2x32xf32, #tpu.memory_space<smem>>
    %238 = arith.index_cast %arg0 : i32 to index
    %c23 = arith.constant 23 : index
    %239 = memref.load %arg5[%238, %c23] : memref<2x32xf32, #tpu.memory_space<smem>>
    %240 = vector.broadcast %233 : f32 to vector<1x256xf32>
    %241 = arith.maximumf %0, %240 : vector<1x256xf32>
    %242 = vector.broadcast %235 : f32 to vector<1x256xf32>
    %243 = arith.maximumf %1, %242 : vector<1x256xf32>
    %244 = vector.broadcast %237 : f32 to vector<1x256xf32>
    %245 = arith.minimumf %2, %244 : vector<1x256xf32>
    %246 = vector.broadcast %239 : f32 to vector<1x256xf32>
    %247 = arith.minimumf %3, %246 : vector<1x256xf32>
    %248 = arith.subf %245, %241 : vector<1x256xf32>
    %cst_26 = arith.constant 0.000000e+00 : f32
    %249 = vector.broadcast %cst_26 : f32 to vector<1x256xf32>
    %250 = arith.maximumf %248, %249 : vector<1x256xf32>
    %251 = arith.subf %247, %243 : vector<1x256xf32>
    %cst_27 = arith.constant 0.000000e+00 : f32
    %252 = vector.broadcast %cst_27 : f32 to vector<1x256xf32>
    %253 = arith.maximumf %251, %252 : vector<1x256xf32>
    %254 = arith.mulf %250, %253 : vector<1x256xf32>
    %255 = arith.subf %237, %233 : f32
    %256 = arith.subf %239, %235 : f32
    %257 = arith.mulf %255, %256 : f32
    %258 = vector.broadcast %257 : f32 to vector<1x256xf32>
    %259 = arith.addf %12, %258 : vector<1x256xf32>
    %260 = arith.subf %259, %254 : vector<1x256xf32>
    %cst_28 = arith.constant 9.99999997E-7 : f32
    %261 = vector.broadcast %cst_28 : f32 to vector<1x256xf32>
    %262 = arith.maximumf %260, %261 : vector<1x256xf32>
    %263 = tpu.reciprocal %262 : vector<1x256xf32> -> vector<1x256xf32>
    %264 = arith.mulf %254, %263 : vector<1x256xf32>
    %265 = arith.cmpf ogt, %264, %223 : vector<1x256xf32>
    %266 = arith.select %265, %264, %223 : vector<1x256xi1>, vector<1x256xf32>
    %267 = vector.broadcast %233 : f32 to vector<1x256xf32>
    %268 = arith.select %265, %267, %225 : vector<1x256xi1>, vector<1x256xf32>
    %269 = vector.broadcast %235 : f32 to vector<1x256xf32>
    %270 = arith.select %265, %269, %227 : vector<1x256xi1>, vector<1x256xf32>
    %271 = vector.broadcast %237 : f32 to vector<1x256xf32>
    %272 = arith.select %265, %271, %229 : vector<1x256xi1>, vector<1x256xf32>
    %273 = vector.broadcast %239 : f32 to vector<1x256xf32>
    %274 = arith.select %265, %273, %231 : vector<1x256xi1>, vector<1x256xf32>
    %275 = arith.index_cast %arg0 : i32 to index
    %c24 = arith.constant 24 : index
    %276 = memref.load %arg5[%275, %c24] : memref<2x32xf32, #tpu.memory_space<smem>>
    %277 = arith.index_cast %arg0 : i32 to index
    %c25 = arith.constant 25 : index
    %278 = memref.load %arg5[%277, %c25] : memref<2x32xf32, #tpu.memory_space<smem>>
    %279 = arith.index_cast %arg0 : i32 to index
    %c26 = arith.constant 26 : index
    %280 = memref.load %arg5[%279, %c26] : memref<2x32xf32, #tpu.memory_space<smem>>
    %281 = arith.index_cast %arg0 : i32 to index
    %c27 = arith.constant 27 : index
    %282 = memref.load %arg5[%281, %c27] : memref<2x32xf32, #tpu.memory_space<smem>>
    %283 = vector.broadcast %276 : f32 to vector<1x256xf32>
    %284 = arith.maximumf %0, %283 : vector<1x256xf32>
    %285 = vector.broadcast %278 : f32 to vector<1x256xf32>
    %286 = arith.maximumf %1, %285 : vector<1x256xf32>
    %287 = vector.broadcast %280 : f32 to vector<1x256xf32>
    %288 = arith.minimumf %2, %287 : vector<1x256xf32>
    %289 = vector.broadcast %282 : f32 to vector<1x256xf32>
    %290 = arith.minimumf %3, %289 : vector<1x256xf32>
    %291 = arith.subf %288, %284 : vector<1x256xf32>
    %cst_29 = arith.constant 0.000000e+00 : f32
    %292 = vector.broadcast %cst_29 : f32 to vector<1x256xf32>
    %293 = arith.maximumf %291, %292 : vector<1x256xf32>
    %294 = arith.subf %290, %286 : vector<1x256xf32>
    %cst_30 = arith.constant 0.000000e+00 : f32
    %295 = vector.broadcast %cst_30 : f32 to vector<1x256xf32>
    %296 = arith.maximumf %294, %295 : vector<1x256xf32>
    %297 = arith.mulf %293, %296 : vector<1x256xf32>
    %298 = arith.subf %280, %276 : f32
    %299 = arith.subf %282, %278 : f32
    %300 = arith.mulf %298, %299 : f32
    %301 = vector.broadcast %300 : f32 to vector<1x256xf32>
    %302 = arith.addf %12, %301 : vector<1x256xf32>
    %303 = arith.subf %302, %297 : vector<1x256xf32>
    %cst_31 = arith.constant 9.99999997E-7 : f32
    %304 = vector.broadcast %cst_31 : f32 to vector<1x256xf32>
    %305 = arith.maximumf %303, %304 : vector<1x256xf32>
    %306 = tpu.reciprocal %305 : vector<1x256xf32> -> vector<1x256xf32>
    %307 = arith.mulf %297, %306 : vector<1x256xf32>
    %308 = arith.cmpf ogt, %307, %266 : vector<1x256xf32>
    %309 = arith.select %308, %307, %266 : vector<1x256xi1>, vector<1x256xf32>
    %310 = vector.broadcast %276 : f32 to vector<1x256xf32>
    %311 = arith.select %308, %310, %268 : vector<1x256xi1>, vector<1x256xf32>
    %312 = vector.broadcast %278 : f32 to vector<1x256xf32>
    %313 = arith.select %308, %312, %270 : vector<1x256xi1>, vector<1x256xf32>
    %314 = vector.broadcast %280 : f32 to vector<1x256xf32>
    %315 = arith.select %308, %314, %272 : vector<1x256xi1>, vector<1x256xf32>
    %316 = vector.broadcast %282 : f32 to vector<1x256xf32>
    %317 = arith.select %308, %316, %274 : vector<1x256xi1>, vector<1x256xf32>
    %318 = arith.index_cast %arg0 : i32 to index
    %c28 = arith.constant 28 : index
    %319 = memref.load %arg5[%318, %c28] : memref<2x32xf32, #tpu.memory_space<smem>>
    %320 = arith.index_cast %arg0 : i32 to index
    %c29 = arith.constant 29 : index
    %321 = memref.load %arg5[%320, %c29] : memref<2x32xf32, #tpu.memory_space<smem>>
    %322 = arith.index_cast %arg0 : i32 to index
    %c30 = arith.constant 30 : index
    %323 = memref.load %arg5[%322, %c30] : memref<2x32xf32, #tpu.memory_space<smem>>
    %324 = arith.index_cast %arg0 : i32 to index
    %c31 = arith.constant 31 : index
    %325 = memref.load %arg5[%324, %c31] : memref<2x32xf32, #tpu.memory_space<smem>>
    %326 = vector.broadcast %319 : f32 to vector<1x256xf32>
    %327 = arith.maximumf %0, %326 : vector<1x256xf32>
    %328 = vector.broadcast %321 : f32 to vector<1x256xf32>
    %329 = arith.maximumf %1, %328 : vector<1x256xf32>
    %330 = vector.broadcast %323 : f32 to vector<1x256xf32>
    %331 = arith.minimumf %2, %330 : vector<1x256xf32>
    %332 = vector.broadcast %325 : f32 to vector<1x256xf32>
    %333 = arith.minimumf %3, %332 : vector<1x256xf32>
    %334 = arith.subf %331, %327 : vector<1x256xf32>
    %cst_32 = arith.constant 0.000000e+00 : f32
    %335 = vector.broadcast %cst_32 : f32 to vector<1x256xf32>
    %336 = arith.maximumf %334, %335 : vector<1x256xf32>
    %337 = arith.subf %333, %329 : vector<1x256xf32>
    %cst_33 = arith.constant 0.000000e+00 : f32
    %338 = vector.broadcast %cst_33 : f32 to vector<1x256xf32>
    %339 = arith.maximumf %337, %338 : vector<1x256xf32>
    %340 = arith.mulf %336, %339 : vector<1x256xf32>
    %341 = arith.subf %323, %319 : f32
    %342 = arith.subf %325, %321 : f32
    %343 = arith.mulf %341, %342 : f32
    %344 = vector.broadcast %343 : f32 to vector<1x256xf32>
    %345 = arith.addf %12, %344 : vector<1x256xf32>
    %346 = arith.subf %345, %340 : vector<1x256xf32>
    %cst_34 = arith.constant 9.99999997E-7 : f32
    %347 = vector.broadcast %cst_34 : f32 to vector<1x256xf32>
    %348 = arith.maximumf %346, %347 : vector<1x256xf32>
    %349 = tpu.reciprocal %348 : vector<1x256xf32> -> vector<1x256xf32>
    %350 = arith.mulf %340, %349 : vector<1x256xf32>
    %351 = arith.cmpf ogt, %350, %309 : vector<1x256xf32>
    %352 = arith.select %351, %350, %309 : vector<1x256xi1>, vector<1x256xf32>
    %353 = vector.broadcast %319 : f32 to vector<1x256xf32>
    %354 = arith.select %351, %353, %311 : vector<1x256xi1>, vector<1x256xf32>
    %355 = vector.broadcast %321 : f32 to vector<1x256xf32>
    %356 = arith.select %351, %355, %313 : vector<1x256xi1>, vector<1x256xf32>
    %357 = vector.broadcast %323 : f32 to vector<1x256xf32>
    %358 = arith.select %351, %357, %315 : vector<1x256xi1>, vector<1x256xf32>
    %359 = vector.broadcast %325 : f32 to vector<1x256xf32>
    %360 = arith.select %351, %359, %317 : vector<1x256xi1>, vector<1x256xf32>
    %cst_35 = arith.constant 5.000000e-01 : f32
    %361 = vector.broadcast %cst_35 : f32 to vector<1x256xf32>
    %362 = arith.cmpf ogt, %352, %361 : vector<1x256xf32>
    %c0_36 = arith.constant 0 : index
    %c0_37 = arith.constant 0 : index
    %c0_38 = arith.constant 0 : index
    %363 = vector.load %arg2[%c0_36, %c0_37, %c0_38] : memref<1x4x256xf32, #tpu.memory_space<vmem>>, vector<1x4x256xf32>
    %364 = vector.shape_cast %363 : vector<1x4x256xf32> to vector<4x256xf32>
    %365 = arith.extui %362 : vector<1x256xi1> to vector<1x256xi32>
    %366 = arith.sitofp %365 : vector<1x256xi32> to vector<1x256xf32>
    %cst_39 = arith.constant 2.500000e-01 : f32
    %cst_40 = arith.constant 7.500000e-01 : f32
    %367 = vector.broadcast %cst_39 : f32 to vector<1x256xf32>
    %368 = vector.broadcast %cst_40 : f32 to vector<1x256xf32>
    %369 = arith.select %362, %367, %368 : vector<1x256xi1>, vector<1x256xf32>
    %cst_41 = arith.constant 1.000000e+00 : f32
    %370 = vector.broadcast %cst_41 : f32 to vector<4x256xf32>
    %371 = arith.subf %370, %364 : vector<4x256xf32>
    %372 = vector.shape_cast %362 : vector<1x256xi1> to vector<1x256xi1>
    %373 = vector.broadcast %372 : vector<1x256xi1> to vector<4x256xi1>
    %374 = arith.select %373, %371, %364 : vector<4x256xi1>, vector<4x256xf32>
    %375 = arith.mulf %374, %374 : vector<4x256xf32>
    %376 = vector.broadcast %369 : vector<1x256xf32> to vector<4x256xf32>
    %377 = arith.mulf %376, %375 : vector<4x256xf32>
    %cst_42 = arith.constant 0.000000e+00 : f32
    %378 = vector.broadcast %cst_42 : f32 to vector<4x256xf32>
    %379 = arith.maximumf %364, %378 : vector<4x256xf32>
    %380 = vector.broadcast %366 : vector<1x256xf32> to vector<4x256xf32>
    %381 = arith.mulf %364, %380 : vector<4x256xf32>
    %382 = arith.subf %379, %381 : vector<4x256xf32>
    %383 = math.absf %364 : vector<4x256xf32>
    %cst_43 = arith.constant 0.000000e+00 : f32
    %384 = vector.broadcast %cst_43 : f32 to vector<4x256xf32>
    %385 = arith.subf %384, %383 : vector<4x256xf32>
    %386 = math.exp %385 : vector<4x256xf32>
    %cst_44 = arith.constant 1.000000e+00 : f32
    %387 = vector.broadcast %cst_44 : f32 to vector<4x256xf32>
    %388 = arith.addf %387, %386 : vector<4x256xf32>
    %389 = math.log %388 : vector<4x256xf32>
    %390 = arith.addf %382, %389 : vector<4x256xf32>
    %391 = arith.mulf %377, %390 : vector<4x256xf32>
    %c0_45 = arith.constant 0 : index
    %c0_46 = arith.constant 0 : index
    %c0_47 = arith.constant 0 : index
    %392 = vector.load %arg6[%c0_45, %c0_46, %c0_47] : memref<1x4x256xf32, #tpu.memory_space<vmem>>, vector<1x4x256xf32>
    %393 = vector.shape_cast %392 : vector<1x4x256xf32> to vector<4x256xf32>
    %394 = vector.shape_cast %391 : vector<4x256xf32> to vector<1x4x256xf32>
    tpu.vector_store %arg6[%c0_45, %c0_46, %c0_47], %394 {strides = array<i32>} : memref<1x4x256xf32, #tpu.memory_space<vmem>>, vector<1x4x256xf32>,
    %c0_48 = arith.constant 0 : index
    %c0_49 = arith.constant 0 : index
    %c0_50 = arith.constant 0 : index
    %395 = vector.load %arg3[%c0_48, %c0_49, %c0_50] : memref<1x4x256xf32, #tpu.memory_space<vmem>>, vector<1x4x256xf32>
    %396 = vector.shape_cast %395 : vector<1x4x256xf32> to vector<4x256xf32>
    %397 = vector.extract_strided_slice %396 {offsets = [0, 0], sizes = [1, 256], strides = [1, 1]} : vector<4x256xf32> to vector<1x256xf32>
    %398 = vector.extract_strided_slice %396 {offsets = [1, 0], sizes = [1, 256], strides = [1, 1]} : vector<4x256xf32> to vector<1x256xf32>
    %399 = vector.extract_strided_slice %396 {offsets = [2, 0], sizes = [1, 256], strides = [1, 1]} : vector<4x256xf32> to vector<1x256xf32>
    %400 = vector.extract_strided_slice %396 {offsets = [3, 0], sizes = [1, 256], strides = [1, 1]} : vector<4x256xf32> to vector<1x256xf32>
    %401 = arith.subf %358, %354 : vector<1x256xf32>
    %402 = arith.subf %360, %356 : vector<1x256xf32>
    %cst_51 = arith.constant 5.000000e-01 : f32
    %403 = vector.broadcast %cst_51 : f32 to vector<1x256xf32>
    %404 = arith.mulf %403, %401 : vector<1x256xf32>
    %405 = arith.addf %354, %404 : vector<1x256xf32>
    %cst_52 = arith.constant 5.000000e-01 : f32
    %406 = vector.broadcast %cst_52 : f32 to vector<1x256xf32>
    %407 = arith.mulf %406, %402 : vector<1x256xf32>
    %408 = arith.addf %356, %407 : vector<1x256xf32>
    %409 = arith.subf %405, %8 : vector<1x256xf32>
    %410 = arith.mulf %409, %13 : vector<1x256xf32>
    %411 = arith.subf %408, %11 : vector<1x256xf32>
    %412 = arith.mulf %411, %14 : vector<1x256xf32>
    %413 = arith.mulf %401, %13 : vector<1x256xf32>
    %cst_53 = arith.constant 1.000000e+00 : f32
    %414 = vector.broadcast %cst_53 : f32 to vector<1x256xf32>
    %415 = arith.select %362, %413, %414 : vector<1x256xi1>, vector<1x256xf32>
    %416 = math.log %415 : vector<1x256xf32>
    %417 = arith.mulf %402, %14 : vector<1x256xf32>
    %cst_54 = arith.constant 1.000000e+00 : f32
    %418 = vector.broadcast %cst_54 : f32 to vector<1x256xf32>
    %419 = arith.select %362, %417, %418 : vector<1x256xi1>, vector<1x256xf32>
    %420 = math.log %419 : vector<1x256xf32>
    %421 = arith.subf %397, %410 : vector<1x256xf32>
    %422 = math.absf %421 : vector<1x256xf32>
    %cst_55 = arith.constant 1.000000e+00 : f32
    %423 = vector.broadcast %cst_55 : f32 to vector<1x256xf32>
    %424 = arith.cmpf olt, %422, %423 : vector<1x256xf32>
    %cst_56 = arith.constant 5.000000e-01 : f32
    %425 = vector.broadcast %cst_56 : f32 to vector<1x256xf32>
    %426 = arith.mulf %425, %421 : vector<1x256xf32>
    %427 = arith.mulf %426, %421 : vector<1x256xf32>
    %cst_57 = arith.constant 5.000000e-01 : f32
    %428 = vector.broadcast %cst_57 : f32 to vector<1x256xf32>
    %429 = arith.subf %422, %428 : vector<1x256xf32>
    %430 = arith.select %424, %427, %429 : vector<1x256xi1>, vector<1x256xf32>
    %431 = arith.subf %398, %412 : vector<1x256xf32>
    %432 = math.absf %431 : vector<1x256xf32>
    %cst_58 = arith.constant 1.000000e+00 : f32
    %433 = vector.broadcast %cst_58 : f32 to vector<1x256xf32>
    %434 = arith.cmpf olt, %432, %433 : vector<1x256xf32>
    %cst_59 = arith.constant 5.000000e-01 : f32
    %435 = vector.broadcast %cst_59 : f32 to vector<1x256xf32>
    %436 = arith.mulf %435, %431 : vector<1x256xf32>
    %437 = arith.mulf %436, %431 : vector<1x256xf32>
    %cst_60 = arith.constant 5.000000e-01 : f32
    %438 = vector.broadcast %cst_60 : f32 to vector<1x256xf32>
    %439 = arith.subf %432, %438 : vector<1x256xf32>
    %440 = arith.select %434, %437, %439 : vector<1x256xi1>, vector<1x256xf32>
    %441 = arith.addf %430, %440 : vector<1x256xf32>
    %442 = arith.subf %399, %416 : vector<1x256xf32>
    %443 = math.absf %442 : vector<1x256xf32>
    %cst_61 = arith.constant 1.000000e+00 : f32
    %444 = vector.broadcast %cst_61 : f32 to vector<1x256xf32>
    %445 = arith.cmpf olt, %443, %444 : vector<1x256xf32>
    %cst_62 = arith.constant 5.000000e-01 : f32
    %446 = vector.broadcast %cst_62 : f32 to vector<1x256xf32>
    %447 = arith.mulf %446, %442 : vector<1x256xf32>
    %448 = arith.mulf %447, %442 : vector<1x256xf32>
    %cst_63 = arith.constant 5.000000e-01 : f32
    %449 = vector.broadcast %cst_63 : f32 to vector<1x256xf32>
    %450 = arith.subf %443, %449 : vector<1x256xf32>
    %451 = arith.select %445, %448, %450 : vector<1x256xi1>, vector<1x256xf32>
    %452 = arith.addf %441, %451 : vector<1x256xf32>
    %453 = arith.subf %400, %420 : vector<1x256xf32>
    %454 = math.absf %453 : vector<1x256xf32>
    %cst_64 = arith.constant 1.000000e+00 : f32
    %455 = vector.broadcast %cst_64 : f32 to vector<1x256xf32>
    %456 = arith.cmpf olt, %454, %455 : vector<1x256xf32>
    %cst_65 = arith.constant 5.000000e-01 : f32
    %457 = vector.broadcast %cst_65 : f32 to vector<1x256xf32>
    %458 = arith.mulf %457, %453 : vector<1x256xf32>
    %459 = arith.mulf %458, %453 : vector<1x256xf32>
    %cst_66 = arith.constant 5.000000e-01 : f32
    %460 = vector.broadcast %cst_66 : f32 to vector<1x256xf32>
    %461 = arith.subf %454, %460 : vector<1x256xf32>
    %462 = arith.select %456, %459, %461 : vector<1x256xi1>, vector<1x256xf32>
    %463 = arith.addf %452, %462 : vector<1x256xf32>
    %cst_67 = arith.constant 0.000000e+00 : f32
    %464 = vector.broadcast %cst_67 : f32 to vector<1x256xf32>
    %465 = arith.select %362, %463, %464 : vector<1x256xi1>, vector<1x256xf32>
    %c0_68 = arith.constant 0 : index
    %c0_69 = arith.constant 0 : index
    %c0_70 = arith.constant 0 : index
    %466 = vector.load %arg7[%c0_68, %c0_69, %c0_70] : memref<1x1x256xf32, #tpu.memory_space<vmem>>, vector<1x1x256xf32>
    %467 = vector.shape_cast %466 : vector<1x1x256xf32> to vector<1x256xf32>
    %468 = vector.shape_cast %465 : vector<1x256xf32> to vector<1x1x256xf32>
    tpu.vector_store %arg7[%c0_68, %c0_69, %c0_70], %468 {strides = array<i32>} : memref<1x1x256xf32, #tpu.memory_space<vmem>>, vector<1x1x256xf32>,
    return
  }
  func.func @transform_0(%arg0: i32, %arg1: i32) -> (i32, i32, i32) {
    %c0_i32 = arith.constant 0 : i32
    %c0_i32_0 = arith.constant 0 : i32
    return %arg0, %c0_i32, %arg1 : i32, i32, i32
  }
  func.func @transform_1(%arg0: i32, %arg1: i32) -> (i32, i32, i32) {
    %c0_i32 = arith.constant 0 : i32
    %c0_i32_0 = arith.constant 0 : i32
    return %arg0, %c0_i32, %arg1 : i32, i32, i32
  }
  func.func @transform_2(%arg0: i32, %arg1: i32) -> (i32, i32) {
    %c0_i32 = arith.constant 0 : i32
    %c0_i32_0 = arith.constant 0 : i32
    return %c0_i32, %arg1 : i32, i32
  }
  func.func @transform_3(%arg0: i32, %arg1: i32) -> (i32, i32) {
    %c0_i32 = arith.constant 0 : i32
    %c0_i32_0 = arith.constant 0 : i32
    %c0_i32_1 = arith.constant 0 : i32
    return %c0_i32, %c0_i32_0 : i32, i32
  }
  func.func @transform_4(%arg0: i32, %arg1: i32) -> (i32, i32, i32) {
    %c0_i32 = arith.constant 0 : i32
    %c0_i32_0 = arith.constant 0 : i32
    return %arg0, %c0_i32, %arg1 : i32, i32, i32
  }
  func.func @transform_5(%arg0: i32, %arg1: i32) -> (i32, i32, i32) {
    %c0_i32 = arith.constant 0 : i32
    %c0_i32_0 = arith.constant 0 : i32
    return %arg0, %c0_i32, %arg1 : i32, i32, i32
  }
}

</mosaic_0001>

<bundles_post_ra>
// kernel: tpu_custom_call.1
= control target key start
LH: loop header
LB: loop body
LE: loop exit
PB: predicated region body
PF: predicated region fallthrough
CT: control target
= control target key end

     0   :  { %s2248_s0 = inlined_call_operand.hbm [shape: f32[2,4,256], index: 0, kind: input, shape index: {}]   ;;  %s2249_s1 = inlined_call_operand.hbm [shape: f32[2,4,256], index: 1, kind: input, shape index: {}]   ;;  %s2250_s2 = inlined_call_operand.hbm [shape: f32[4,256], index: 2, kind: input, shape index: {}]   ;;  %s2251_s3 = inlined_call_operand.vmem [shape: f32[2,32], index: 3, kind: input, shape index: {}]   ;;  %s2252_s4 = inlined_call_operand.hbm [shape: f32[2,4,256], index: 4, kind: output, shape index: {0}]   ;;  %s2253_s5 = inlined_call_operand.hbm [shape: f32[2,1,256], index: 5, kind: output, shape index: {1}]  }
   0x1   :  { %2281 = sst [smem:[#allocation38_spill]] %s2248_s0 }
   0x2   :  { %2282 = sst [smem:[#allocation39_spill]] %s2249_s1 }
   0x3   :  { %2283 = sst [smem:[#allocation40_spill]] %s2250_s2 }
   0x4   :  { %2284 = sst [smem:[#allocation41_spill]] %s2251_s3 }
   0x5   :  { %2285 = sst [smem:[#allocation42_spill]] %s2252_s4 }
   0x6   :  { %2286 = sst [smem:[#allocation43_spill]] %s2253_s5 }
   0x7   :  { %11 = vsyncpa [#allocation3], 0 }
   0x8   :  { %13 = vsyncpa [#allocation3 + $0x1], 0 }
   0x9   :  { %14 = vsyncpa [#allocation7], 0 }
   0xa   :  { %16 = vsyncpa [#allocation7 + $0x1], 0 }
   0xb   :  { %17 = vsyncpa [#allocation5], 0 }
   0xc   :  { %18 = vsyncpa [#allocation4], 0 }
   0xd   :  { %20 = vsyncpa [#allocation4 + $0x1], 0 }
   0xe   :  { %21 = vsyncpa [#allocation12], 0 }
   0xf   :  { %23 = vsyncpa [#allocation12 + $0x1], 0  ;;  %s1483_s18 = smov 0   ;;  %s1485_s19 = smov 0  }
  0x10   :  { %s1487_s20 = smov 0   ;;  %s1489_s21 = smov 0  }
  0x11   :  { %s1491_s22 = smov 0   ;;  %s1493_s23 = smov 0  }
  0x12 LB: > { %2287 = sst [smem:[#allocation19_spill]] %s1420_s18  ;;  %s1514_s24 = sadd.s32 4294967295, %s1440_s23   ;;  %s1440_s23 = sphi %s1493_s23, %s29_s23   ;;  %s1436_s22 = sphi %s1491_s22, %s2365_s22   ;;  %s1432_s21 = sphi %s1489_s21, %s2364_s21   ;;  %s1428_s20 = sphi %s1487_s20, %s2363_s20   ;;  %s1424_s19 = sphi %s1485_s19, %s2362_s19   ;;  %s1420_s18 = sphi %s1483_s18, %s2361_s18  }
  0x13   : > { %2288 = sst [smem:[#allocation20_spill]] %s1424_s19  ;;  %s1055_s25 = sadd.s32 4294967294, %s1440_s23  }
  0x14   : > { %2289 = sst [smem:[#allocation21_spill]] %s1428_s20  ;;  %p63_p0 = scmp.ne.s32.totalorder %s1424_s19, %s1420_s18 }
  0x15   : > { %2290 = sst [smem:[#allocation22_spill]] %s1432_s21  ;;  %p2254_p1 = scmp.eq.s32.totalorder %s1514_s24, 0 }
  0x16   : > { %2291 = sst [smem:[#allocation23_spill]] %s1436_s22  ;;  %p170_p3 = scmp.eq.s32.totalorder %s1055_s25, 1 }
  0x17   : > { %2292 = sst [smem:[#allocation24_spill]] %s1440_s23  ;;  %p1523_p4 = por %p2254_p1, %p63_p0 }
  0x18   : > { %p1056_p5 = scmp.ge.s32.totalorder %s1440_s23, 1  ;;  %p1528_p6 = por %p170_p3, %p63_p0 }
  0x19   : > { %s2293_s26 = scalar_select %p1523_p4, 1, 0 }
  0x1a   : > { %s2294_s27 = scalar_select %p1528_p6, 1, 0 }
  0x1b   : > { %p205_p7 = scmp.lt.s32.totalorder %s1440_s23, 3  ;;  %s1442_s29 = smov [#allocation8]  }
  0x1c   : > { %2295 = sst [smem:[#allocation25_spill]] %s2294_s27  ;;  %s221_s30 = sshll.u32 %s1442_s29, 4  ;;  %s222_s30 = int_to_ptr.vmem [resolvable:$true] %s221_s30 }
  0x1d   : > { %p1533_p8 = pnand %p1056_p5, %p205_p7  ;;  %s2297_s3 = sld [smem:[#allocation41_spill]] }
  0x1e   : > { %s1232_s10 = scalar_lea.vmem %s222_s30, 128  ;;  %p1240_p5 = scmp.lt.s32.totalorder %s222_s30, %s222_s30 }
  0x1f   : > { %s2296_s28 = scalar_select %p1533_p8, 1, 0 }
  0x20   : > { %p1110_p10 = pneg %p1533_p8  ;;  %p1233_p13 = scmp.ne.s32.totalorder %s222_s30, %s1232_s10 }
  0x21   : > { %p1241_p7 = scmp.lt.s32.totalorder %s1232_s10, %s1232_s10 }
  0x22   : > { %p1545_p11 = pnand %p1110_p10, %p2254_p1 }
  0x23   : > { %s232_s8 = sshll.u32 %s2297_s3, 4  ;;  %p1242_p9 = por %p1241_p7, %p1240_p5  ;;  %s233_s8 = int_to_ptr.vmem [resolvable:$true] %s232_s8 }
  0x24   : > { %p1223_p12 = pneg %p1545_p11 }
  0x26   : > { %p1235_p0 = pnand %p1233_p13, %p1223_p12 }
  0x28   : > { %p1236_p3 = pneg %p1235_p0 }
  0x2a   : > { %p1243_p2 = pnand %p1242_p9, %p1236_p3 }
  0x2c   : > { %1246 = shalt.err (!%p1243_p2)
}
  0x2d   : > { %s2299_s2 = sld [smem:[#allocation40_spill]]  ;;  %s1247_s13 = scalar_lea.vmem %s233_s8, 32 }
  0x2e   : > { %p1248_p10 = scmp.ne.s32.totalorder %s233_s8, %s1247_s13  ;;  %p1255_p13 = scmp.lt.s32.totalorder %s233_s8, %s233_s8 }
  0x2f   : > { %p1256_p0 = scmp.lt.s32.totalorder %s1247_s13, %s1247_s13 }
  0x30   : > { %p1250_p1 = pnand %p1248_p10, %p1223_p12 }
  0x31   : > { %p1257_p4 = por %p1256_p0, %p1255_p13 }
  0x32   : > { %p1251_p6 = pneg %p1250_p1 }
  0x33   : > { %1113 = dma.hbm_to_vmem [thread:$0]  (!%p1545_p11), %s2299_s2, 128, %s222_s30, [#allocation7]  }
  0x34   : > { %p1258_p8 = pnand %p1257_p4, %p1251_p6 }
  0x36   : > { %1261 = shalt.err (!%p1258_p8)
}
  0x37   : > { %s1443_s14 = smov [#allocation9]   ;;  %s41_s15 = sadd.s32 1, %s1436_s22 }
  0x38   : > { %1116 = dma.vmem_to_smem (!%p1545_p11), %s233_s8, 32, %s1443_s14, [#allocation5]  }
  0x39   : > { %s50_s16 = sadd.s32 1, %s1428_s20  ;;  %p43_p1 = scmp.ge.s32.totalorder %s41_s15, 2 }
  0x3a   : > { %p57_p2 = scmp.ne.s32.totalorder %s1428_s20, %s1424_s19  ;;  %p58_p4 = scmp.eq.s32.totalorder %s1440_s23, 0 }
  0x3b   : > { %p1133_p6 = scmp.lt.s32.totalorder %s1440_s23, 2  ;;  %s2367_s15 = smov (%p43_p1, %s41_s15), 0 }
  0x3c   : > { %2300 = sst [smem:[#allocation26_spill]] %s2367_s15  ;;  %p59_p8 = por %p58_p4, %p57_p2 }
  0x3d   : > { %p2301_p9 = scmp.eq.s32.totalorder %s1514_s24, 1  ;;  %s45_s25 = ssub.s32 %s1436_s22, %s2367_s15 }
  0x3e   : > { %s243_s29 = sand.u32 1, %s1428_s20   ;;  %p48_p3 = scmp.eq.s32.totalorder %s45_s25, 0 }
  0x3f   : > { %p1574_p12 = por %p2301_p9, %p57_p2  ;;  %s1060_s30 = sshll.u32 %s243_s29, 3 }
  0x40   : > { %s1090_s6 = sshll.u32 %s1436_s22, 7  ;;  %s2305_s0 = sld [smem:[#allocation38_spill]] }
  0x41   : > { %s2302_s17 = scalar_select %p1574_p12, 1, 0 }
  0x42   : > { %s1583_s7 = scalar_select %p48_p3, %s1428_s20, %s50_s16  }
  0x43   : > { %2303 = sst [smem:[#allocation27_spill]] %s2302_s17  ;;  %s247_s11 = scalar_lea.vmem [#allocation2], %s1060_s30 }
  0x44   : > { %2304 = sst [smem:[#allocation28_spill]] %s1583_s7  ;;  %s257_s12 = sshll.u32 %s247_s11, 4  ;;  %s258_s12 = int_to_ptr.vmem [resolvable:$true] %s257_s12 }
  0x45   : > { %p1590_p11 = pnand %p1133_p6, %p59_p8  ;;  %s2307_s1 = sld [smem:[#allocation39_spill]] }
  0x46   : > { %s255_s10 = scalar_lea.hbm %s2305_s0, %s1090_s6  ;;  %s244_s16 = scalar_lea.sflag [#allocation3], %s243_s29 }
  0x47   : > { %p1264_p5 = pneg %p1590_p11  ;;  %s1275_s8 = scalar_lea.vmem %s258_s12, 128 }
  0x48   : > { %p1276_p7 = scmp.ne.s32.totalorder %s258_s12, %s1275_s8  ;;  %s1444_s9 = smov [#allocation2]  }
  0x49   : > { %s1280_s11 = sshll.u32 %s1444_s9, 4  ;;  %s1281_s11 = int_to_ptr.vmem [resolvable:$false] %s1280_s11 }
  0x4a   : > { %p1278_p10 = pnand %p1276_p7, %p1264_p5  ;;  %s1282_s0 = scalar_lea.vmem %s1281_s11, 256 }
  0x4b   : > { %s1597_s2 = scalar_lea.hbm %s2307_s1, %s1090_s6  ;;  %p1283_p0 = scmp.lt.s32.totalorder %s258_s12, %s1281_s11 }
  0x4c   : > { %p1279_p13 = pneg %p1278_p10  ;;  %p1284_p1 = scmp.lt.s32.totalorder %s1282_s0, %s1275_s8 }
  0x4e   : > { %p1285_p2 = por %p1284_p1, %p1283_p0 }
  0x50   : > { %p1286_p4 = pnand %p1285_p2, %p1279_p13 }
  0x52   : > { %1289 = shalt.err (!%p1286_p4)
}
  0x53   : > { %1120 = dma.hbm_to_vmem [thread:$0]  (!%p1590_p11), %s255_s10, 128, %s258_s12, %s244_s16  }
  0x54   : > { %s264_s29 = sand.u32 1, %s1440_s23   ;;  %s268_s6 = scalar_lea.vmem [#allocation6], %s1060_s30 }
  0x55   : > { %s278_s14 = sshll.u32 %s268_s6, 4  ;;  %s265_s25 = scalar_lea.sflag [#allocation7], %s264_s29  ;;  %s279_s14 = int_to_ptr.vmem [resolvable:$true] %s278_s14 }
  0x56   : > { %s1303_s1 = scalar_lea.vmem %s279_s14, 128  ;;  %s1445_s0 = smov [#allocation6]  }
  0x57   : > { %p1304_p6 = scmp.ne.s32.totalorder %s279_s14, %s1303_s1  ;;  %s1308_s8 = sshll.u32 %s1445_s0, 4  ;;  %s1309_s8 = int_to_ptr.vmem [resolvable:$false] %s1308_s8 }
  0x58   : > { %s1310_s9 = scalar_lea.vmem %s1309_s8, 256  ;;  %p1311_p3 = scmp.lt.s32.totalorder %s279_s14, %s1309_s8 }
  0x59   : > { %p1306_p8 = pnand %p1304_p6, %p1264_p5  ;;  %p1312_p7 = scmp.lt.s32.totalorder %s1310_s9, %s1303_s1 }
  0x5b   : > { %p1307_p9 = pneg %p1306_p8  ;;  %p1313_p10 = por %p1312_p7, %p1311_p3 }
  0x5d   : > { %p1314_p13 = pnand %p1313_p10, %p1307_p9 }
  0x5f   : > { %1317 = shalt.err (!%p1314_p13)
}
  0x60   : > { %1123 = dma.hbm_to_vmem [thread:$0]  (!%p1590_p11), %s1597_s2, 128, %s279_s14, %s265_s25  }
  0x61   : > { %p2308_p0 = scmp.ne.s32.totalorder %s2296_s28, 0 }
  0x63   : > { %287 = sbr.rel (%p2308_p0) target bundleno = 275 (0x113), region = 36 }
  0x68   : > { %s1616_s30 = sand.u32 1, %s1424_s19   ;;  %p2311_p5 = scmp.ne.s32.totalorder %s2293_s26, 0 }
  0x69   : > { %2309 = sst [smem:[#allocation29_spill]] %s1616_s30  ;;  %s1619_s10 = sshll.u32 %s1616_s30, 3 }
  0x6a   : > { %2310 = sst [smem:[#allocation30_spill]] %s1619_s10  ;;  %s290_s1 = scalar_lea.sflag [#allocation3], %s1616_s30 }
  0x6b   : > { %1395 = dma.done.wait (%p2311_p5), %s290_s1, 128  }
  0x6c   : > { %1397 = vsyncadd (%p2311_p5), %s290_s1, 4294967168  ;;  %s298_s2 = sand.u32 1, %s1514_s24  }
  0x6d   : > { %s299_s28 = scalar_lea.sflag [#allocation7], %s298_s2 }
  0x6e   : > { %1399 = dma.done.wait (%p2311_p5), %s299_s28, 128  }
  0x6f   : > { %1401 = vsyncadd (%p2311_p5), %s299_s28, 4294967168  ;;  %p2312_p11 = scmp.eq.s32.totalorder %s1514_s24, 0 }
  0x71   : > { %1403 = dma.done.wait (%p2312_p11), [#allocation7], 128   ;;  %p2313_p1 = pmov %p2312_p11 }
  0x73   : > { %1405 = vsyncadd (%p2313_p1), [#allocation7], 4294967168  ;;  %p2314_p2 = pmov %p2313_p1 }
  0x74   : > { %p2315_p4 = pmov %p2313_p1 }
  0x75   : > { %1407 = dma.done.wait (%p2314_p2), [#allocation5], 32  }
  0x76   : > { %1409 = vsyncadd (%p2315_p4), [#allocation5], 4294967264 }
  0x77   : > { %315 = sfence }
  0x78   : > { %s1642_s16 = sshll.u32 %s1432_s21, 7  ;;  %v1651_v0 = vld [vmem:[#allocation8] ss:$4 sm:$0x3] }
  0x79   : > { %s1645_s26 = sld [smem:[#allocation9 + %s1642_s16]]  ;;  %s371_s11 = sadd.s32 1, %s1642_s16  ;;  %v1656_v1 = vld [vmem:[#allocation8 + $0x1] ss:$4 sm:$0x3] }
  0x7a   : > { %s1648_s29 = sld [smem:[#allocation9 + %s371_s11]]  ;;  %s373_s6 = sadd.s32 2, %s1642_s16  ;;  %v1661_v2 = vld [vmem:[#allocation8 + $0x2] ss:$4 sm:$0x3] }
  0x7b   : > { %s1653_s24 = sld [smem:[#allocation9 + %s373_s6]]  ;;  %s375_s14 = sadd.s32 3, %s1642_s16  ;;  %v1666_v3 = vld [vmem:[#allocation8 + $0x3] ss:$4 sm:$0x3]  ;;  %v1673_v4 = vsub.f32 %v1661_v2, %v1651_v0 }
  0x7c   : > { %s1658_s25 = sld [smem:[#allocation9 + %s375_s14]]  ;;  %s405_s0 = sadd.s32 4, %s1642_s16  ;;  %v1677_v5 = vsub.f32 %v1666_v3, %v1656_v1 }
  0x7d   : > { %s1663_s8 = sld [smem:[#allocation9 + %s405_s0]]  ;;  %s407_s9 = sadd.s32 5, %s1642_s16 }
  0x7e   : > { %s1668_s1 = sld [smem:[#allocation9 + %s407_s9]]  ;;  %s409_s2 = sadd.s32 6, %s1642_s16  ;;  %v1706_v13 = vmul.f32 %v1677_v5, %v1673_v4 }
  0x7f   : > { %v377_v6 = vstv %s1645_s26  ;;  %s1680_s28 = sld [smem:[#allocation9 + %s409_s2]]  ;;  %s411_s11 = sadd.s32 7, %s1642_s16 }
  0x80   : > { %v378_v7 = vmax.f32 %v1651_v0, %v377_v6  ;;  %v379_v8 = vstv %s1648_s29  ;;  %s1687_s6 = sld [smem:[#allocation9 + %s411_s11]]  ;;  %s441_s14 = sadd.s32 8, %s1642_s16 }
  0x81   : > { %v380_v9 = vmax.f32 %v1656_v1, %v379_v8  ;;  %v381_v10 = vstv %s1653_s24  ;;  %s390_s0 = ssub.f32 %s1653_s24, %s1645_s26  ;;  %s443_s9 = sadd.s32 9, %s1642_s16 }
  0x82   : > { %v382_v11 = vmin.f32 %v1661_v2, %v381_v10  ;;  %v383_v12 = vstv %s1658_s25  ;;  %s391_s2 = ssub.f32 %s1658_s25, %s1648_s29  ;;  %s445_s11 = sadd.s32 10, %s1642_s16 }
  0x83   : > { %v384_v14 = vmin.f32 %v1666_v3, %v383_v12  ;;  %v413_v15 = vstv %s1663_s8  ;;  %s1712_s13 = sld [smem:[#allocation9 + %s441_s14]]  ;;  %s447_s12 = sadd.s32 11, %s1642_s16 }
  0x84   : > { %v385_v16 = vsub.f32 %v382_v11, %v378_v7  ;;  %s392_s3 = smul.f32 %s391_s2, %s390_s0  ;;  %v414_v17 = vmax.f32 %v1651_v0, %v413_v15  ;;  %v415_v18 = vstv %s1668_s1  ;;  %s1719_s15 = sld [smem:[#allocation9 + %s443_s9]] }
  0x85   : > { %v387_v19 = vsub.f32 %v384_v14, %v380_v9  ;;  %v416_v20 = vmax.f32 %v1656_v1, %v415_v18  ;;  %v417_v21 = vstv %s1680_s28  ;;  %s426_s14 = ssub.f32 %s1680_s28, %s1663_s8  ;;  %s477_s22 = sadd.s32 12, %s1642_s16 }
  0x86   : > { %v386_v22 = vmax.f32 %v385_v16, 0.0  ;;  %v393_v23 = vstv %s392_s3  ;;  %v418_v24 = vmin.f32 %v1661_v2, %v417_v21  ;;  %v419_v25 = vstv %s1687_s6  ;;  %s427_s0 = ssub.f32 %s1687_s6, %s1668_s1  ;;  %s479_s2 = sadd.s32 13, %s1642_s16 }
  0x87   : > { %v388_v26 = vmax.f32 %v387_v19, 0.0  ;;  %v394_v27 = vadd.f32 %v393_v23, %v1706_v13  ;;  %v420_v28 = vmin.f32 %v1666_v3, %v419_v25  ;;  %s1739_s9 = sld [smem:[#allocation9 + %s445_s11]]  ;;  %s481_s7 = sadd.s32 14, %s1642_s16 }
  0x88   : > { %v421_v29 = vsub.f32 %v418_v24, %v414_v17  ;;  %s428_s3 = smul.f32 %s427_s0, %s426_s14  ;;  %s1742_s20 = sld [smem:[#allocation9 + %s447_s12]] }
  0x89   : > { %v1744_v30 = vmul.f32 %v388_v26, %v386_v22  ;;  %v423_v31 = vsub.f32 %v420_v28, %v416_v20  ;;  %v449_v32 = vstv %s1712_s13  ;;  %s1747_s19 = sld [smem:[#allocation9 + %s477_s22]]  ;;  %s483_s23 = sadd.s32 15, %s1642_s16 }
  0x8a   : > { %v422_v33 = vmax.f32 %v421_v29, 0.0  ;;  %v429_v34 = vstv %s428_s3  ;;  %v451_v35 = vstv %s1719_s15  ;;  %s1751_s12 = sld [smem:[#allocation9 + %s479_s2]]  ;;  %v450_v39 = vmax.f32 %v1651_v0, %v449_v32  ;;  %s513_s14 = sadd.s32 16, %s1642_s16 }
  0x8b   : > { %v395_v36 = vsub.f32 %v394_v27, %v1744_v30  ;;  %v424_v37 = vmax.f32 %v423_v31, 0.0  ;;  %v430_v38 = vadd.f32 %v429_v34, %v1706_v13  ;;  %s1755_s22 = sld [smem:[#allocation9 + %s481_s7]]  ;;  %v452_v42 = vmax.f32 %v1656_v1, %v451_v35  ;;  %s515_s0 = sadd.s32 17, %s1642_s16 }
  0x8c   : > { %s1760_s11 = sld [smem:[#allocation9 + %s483_s23]]  ;;  %s517_s2 = sadd.s32 18, %s1642_s16 }
  0x8d   : > { %v396_v40 = vmax.f32 %v395_v36, 1e-06  ;;  %v1763_v41 = vmul.f32 %v424_v37, %v422_v33  ;;  %v453_v43 = vstv %s1739_s9  ;;  %s462_s7 = ssub.f32 %s1739_s9, %s1712_s13  ;;  %s519_s27 = sadd.s32 19, %s1642_s16 }
  0x8e   : > { %v454_v44 = vmin.f32 %v1661_v2, %v453_v43  ;;  %v455_v45 = vstv %s1742_s20  ;;  %s463_s23 = ssub.f32 %s1742_s20, %s1719_s15  ;;  %s549_s21 = sadd.s32 20, %s1642_s16 }
  0x8f   : > { %1193 = vrcp.f32 %v396_v40  ;;  %v431_v46 = vsub.f32 %v430_v38, %v1763_v41  ;;  %v456_v47 = vmin.f32 %v1666_v3, %v455_v45  ;;  %v485_v48 = vstv %s1747_s19  ;;  %s1784_s3 = sld [smem:[#allocation9 + %s513_s14]]  ;;  %s553_s4 = sadd.s32 22, %s1642_s16 }
  0x90   : > { %v457_v49 = vsub.f32 %v454_v44, %v450_v39  ;;  %s464_s18 = smul.f32 %s463_s23, %s462_s7  ;;  %v486_v50 = vmax.f32 %v1651_v0, %v485_v48  ;;  %v487_v51 = vstv %s1751_s12  ;;  %s1791_s5 = sld [smem:[#allocation9 + %s515_s0]] }
  0x91   : > { %v432_v52 = vmax.f32 %v431_v46, 1e-06  ;;  %v459_v53 = vsub.f32 %v456_v47, %v452_v42  ;;  %v488_v54 = vmax.f32 %v1656_v1, %v487_v51  ;;  %v489_v55 = vstv %s1755_s22  ;;  %s498_s14 = ssub.f32 %s1755_s22, %s1747_s19  ;;  %s551_s0 = sadd.s32 21, %s1642_s16 }
  0x92   : > { %2316 = sst [smem:[#allocation31_spill]] %s1760_s11  ;;  %v458_v56 = vmax.f32 %v457_v49, 0.0  ;;  %v465_v57 = vstv %s464_s18  ;;  %v490_v58 = vmin.f32 %v1661_v2, %v489_v55  ;;  %v491_v59 = vstv %s1760_s11 }
  0x93   : > { %s499_s7 = ssub.f32 %s1760_s11, %s1751_s12  ;;  %1195 = vrcp.f32 %v432_v52  ;;  %v460_v60 = vmax.f32 %v459_v53, 0.0  ;;  %v466_v61 = vadd.f32 %v465_v57, %v1706_v13  ;;  %v492_v62 = vmin.f32 %v1666_v3, %v491_v59  ;;  %s555_s11 = sadd.s32 23, %s1642_s16 }
  0x94   : > { %s1811_s23 = sld [smem:[#allocation9 + %s517_s2]]  ;;  %v493_v63 = vsub.f32 %v490_v58, %v486_v50 }
  0x95   : > { %2317 = sst [smem:[#allocation32_spill]] %s1784_s3  ;;  %s500_s18 = smul.f32 %s499_s7, %s498_s14  ;;  %v1816_v7 = vmul.f32 %v460_v60, %v458_v56  ;;  %v495_v9 = vsub.f32 %v492_v62, %v488_v54  ;;  %v521_v11 = vstv %s1784_s3 }
  0x96   : > { %2318 = sst [smem:[#allocation33_spill]] %s1791_s5  ;;  %v494_v14 = vmax.f32 %v493_v63, 0.0  ;;  %v523_v17 = vstv %s1791_s5  ;;  %v522_v23 = vmax.f32 %v1651_v0, %v521_v11  ;;  %s585_s14 = sadd.s32 24, %s1642_s16 }
  0x97   : > { %s1814_s17 = sld [smem:[#allocation9 + %s519_s27]]  ;;  %v501_v16 = vstv %s500_s18  ;;  %v467_v19 = vsub.f32 %v466_v61, %v1816_v7  ;;  %v496_v20 = vmax.f32 %v495_v9, 0.0  ;;  %v524_v27 = vmax.f32 %v1656_v1, %v523_v17  ;;  %s589_s18 = sadd.s32 26, %s1642_s16 }
  0x98   : > { %s1819_s30 = sld [smem:[#allocation9 + %s549_s21]]  ;;  %v502_v22 = vadd.f32 %v501_v16, %v1706_v13 }
  0x99   : > { %s1823_s27 = sld [smem:[#allocation9 + %s551_s0]]  ;;  %v468_v24 = vmax.f32 %v467_v19, 1e-06  ;;  %v1835_v26 = vmul.f32 %v496_v20, %v494_v14  ;;  %s2323_s0 = scalar_lea.vmem [#allocation2], %s1619_s10 }
  0x9a   : > { %2319 = sst [smem:[#allocation34_spill]] %s1811_s23  ;;  %v525_v28 = vstv %s1811_s23  ;;  %v1846_v29 = vld [vmem:[%s2323_s0] sm:$0xff]  ;;  %s591_s0 = sadd.s32 27, %s1642_s16 }
  0x9b   : > { %s1827_s21 = sld [smem:[#allocation9 + %s553_s4]]  ;;  %s587_s4 = sadd.s32 25, %s1642_s16  ;;  %v526_v31 = vmin.f32 %v1661_v2, %v525_v28  ;;  %1197 = vrcp.f32 %v468_v24  ;;  %v503_v34 = vsub.f32 %v502_v22, %v1835_v26  ;;  %v710_v42 = vand.u32 2147483647, %v1846_v29 }
  0x9c   : > { %s1832_s2 = sld [smem:[#allocation9 + %s555_s11]]  ;;  %v1194_v38 = vpop.eup %1193 }
  0x9d   : > { %2320 = sst [smem:[#allocation35_spill]] %s1814_s17  ;;  %v527_v33 = vstv %s1814_s17  ;;  %v529_v39 = vsub.f32 %v526_v31, %v522_v23  ;;  %v1870_v44 = vmul.f32 %v1194_v38, %v1744_v30  ;;  %v504_v46 = vmax.f32 %v503_v34, 1e-06 }
  0x9e   : > { %2321 = sst [smem:[#allocation36_spill]] %s1819_s30  ;;  %v528_v36 = vmin.f32 %v1666_v3, %v527_v33  ;;  %v557_v37 = vstv %s1819_s30  ;;  %v711_v60 = vsub.f32 0.0, %v710_v42 }
  0x9f   : > { %2322 = sst [smem:[#allocation37_spill]] %s1823_s27  ;;  %v558_v40 = vmax.f32 %v1651_v0, %v557_v37  ;;  %v559_v49 = vstv %s1823_s27  ;;  %v530_v50 = vmax.f32 %v529_v39, 0.0  ;;  %vm399_vm0 = vcmp.gt.f32.partialorder %v1870_v44, -1.0 }
  0xa0   : > { %s534_s7 = ssub.f32 %s1811_s23, %s1784_s3  ;;  %v531_v47 = vsub.f32 %v528_v36, %v524_v27  ;;  %1199 = vrcp.f32 %v504_v46  ;;  %s625_s3 = sadd.s32 30, %s1642_s16  ;;  %v1196_v57 = vpop.eup %1195  ;;  %v560_v58 = vmax.f32 %v1656_v1, %v559_v49  ;;  %v400_v61 = vsel %vm399_vm0, %v1870_v44, -1.0 }
  0xa1   : > { %s535_s11 = ssub.f32 %s1814_s17, %s1791_s5  ;;  %s621_s17 = sadd.s32 28, %s1642_s16  ;;  %v561_v53 = vstv %s1827_s21  ;;  %v434_v62 = vmul.f32 %v1196_v57, %v1763_v41  ;;  %v712_v24 = vmul.f32 1.442695, %v711_v60 }
  0xa2   : > { %s1860_s10 = sld [smem:[#allocation9 + %s585_s14]]  ;;  %v563_v54 = vstv %s1832_s2  ;;  %v532_v30 = vmax.f32 %v531_v47, 0.0  ;;  %v562_v9 = vmin.f32 %v1661_v2, %v561_v53 }
  0xa3   : > { %s536_s23 = smul.f32 %s535_s11, %s534_s7  ;;  %s1866_s5 = sld [smem:[#allocation9 + %s587_s4]]  ;;  %v564_v14 = vmin.f32 %v1666_v3, %v563_v54  ;;  %vm1913_vm1 = vcmp.gt.f32.partialorder %v434_v62, %v400_v61 }
  0xa4   : > { %s570_s14 = ssub.f32 %s1827_s21, %s1819_s30  ;;  %s623_s4 = sadd.s32 29, %s1642_s16  ;;  %v1895_v63 = vmul.f32 %v532_v30, %v530_v50  ;;  %v565_v19 = vsub.f32 %v562_v9, %v558_v40  ;;  %v436_v30 = vsel %vm1913_vm1, %v434_v62, %v400_v61 }
  0xa5   : > { %v537_v52 = vstv %s536_s23  ;;  %s571_s7 = ssub.f32 %s1832_s2, %s1823_s27  ;;  %s627_s27 = sadd.s32 31, %s1642_s16  ;;  %v567_v34 = vsub.f32 %v564_v14, %v560_v58 }
  0xa6   : > { %v538_v56 = vadd.f32 %v537_v52, %v1706_v13  ;;  %s1883_s11 = sld [smem:[#allocation9 + %s589_s18]]  ;;  %v566_v31 = vmax.f32 %v565_v19, 0.0 }
  0xa7   : > { %s572_s23 = smul.f32 %s571_s7, %s570_s14  ;;  %s1889_s30 = sld [smem:[#allocation9 + %s591_s0]]  ;;  %v568_v46 = vmax.f32 %v567_v34, 0.0 }
  0xa8   : > { %s1900_s18 = sld [smem:[#allocation9 + %s621_s17]]  ;;  %v539_v41 = vsub.f32 %v538_v56, %v1895_v63  ;;  %v593_v20 = vstv %s1860_s10  ;;  %v1198_v52 = vpop.eup %1197 }
  0xa9   : > { %v573_v16 = vstv %s572_s23  ;;  %s1906_s0 = sld [smem:[#allocation9 + %s623_s4]]  ;;  %v595_v22 = vstv %s1866_s5  ;;  %v594_v38 = vmax.f32 %v1651_v0, %v593_v20  ;;  %v470_v56 = vmul.f32 %v1198_v52, %v1816_v7 }
  0xaa   : > { %s1911_s17 = sld [smem:[#allocation9 + %s625_s3]]  ;;  %v540_v27 = vmax.f32 %v539_v41, 1e-06  ;;  %v574_v36 = vadd.f32 %v573_v16, %v1706_v13  ;;  %v596_v39 = vmax.f32 %v1656_v1, %v595_v22  ;;  %v569_v57 = vmul.f32 %v568_v46, %v566_v31 }
  0xab   : > { %s1917_s14 = sld [smem:[#allocation9 + %s627_s27]]  ;;  %vm1948_vm2 = vcmp.gt.f32.partialorder %v470_v56, %v436_v30 }
  0xac   : > { %s606_s7 = ssub.f32 %s1883_s11, %s1860_s10  ;;  %v597_v40 = vstv %s1883_s11  ;;  %1201 = vrcp.f32 %v540_v27  ;;  %v575_v41 = vsub.f32 %v574_v36, %v569_v57 }
  0xad   : > { %v599_v42 = vstv %s1889_s30  ;;  %s607_s3 = ssub.f32 %s1889_s30, %s1866_s5  ;;  %v598_v47 = vmin.f32 %v1661_v2, %v597_v40  ;;  %1203 = vpow2.f32 %v712_v24  ;;  %v1200_v24 = vpop.eup %1199 }
  0xae   : > { %v600_v50 = vmin.f32 %v1666_v3, %v599_v42  ;;  %v629_v14 = vstv %s1900_s18  ;;  %v576_v27 = vmax.f32 %v575_v41, 1e-06  ;;  %v506_v36 = vmul.f32 %v1200_v24, %v1835_v26  ;;  %s2345_s5 = sld [smem:[#allocation30_spill]] }
  0xaf   : > { %s608_s27 = smul.f32 %s607_s3, %s606_s7  ;;  %v601_v58 = vsub.f32 %v598_v47, %v594_v38  ;;  %v631_v16 = vstv %s1906_s0  ;;  %v630_v34 = vmax.f32 %v1651_v0, %v629_v14  ;;  %s2347_s30 = sld [smem:[#allocation29_spill]] }
  0xb0   : > { %v603_v60 = vsub.f32 %v600_v50, %v596_v39  ;;  %s642_s4 = ssub.f32 %s1911_s17, %s1900_s18  ;;  %v633_v62 = vstv %s1911_s17  ;;  %v632_v38 = vmax.f32 %v1656_v1, %v631_v16  ;;  %v472_v50 = vsel %vm1948_vm2, %v470_v56, %v436_v30 }
  0xb1   : > { %v609_v9 = vstv %s608_s27  ;;  %s643_s23 = ssub.f32 %s1917_s14, %s1906_s0  ;;  %v602_v19 = vmax.f32 %v601_v58, 0.0  ;;  %v634_v46 = vmin.f32 %v1661_v2, %v633_v62  ;;  %v635_v47 = vstv %s1917_s14 }
  0xb2   : > { %v604_v61 = vmax.f32 %v603_v60, 0.0  ;;  %v610_v39 = vadd.f32 %v609_v9, %v1706_v13  ;;  %1205 = vrcp.f32 %v576_v27  ;;  %v636_v52 = vmin.f32 %v1666_v3, %v635_v47  ;;  %s2349_s9 = sld [smem:[#allocation42_spill]] }
  0xb3   : > { %s644_s7 = smul.f32 %s643_s23, %s642_s4  ;;  %v637_v41 = vsub.f32 %v634_v46, %v630_v34  ;;  %vm1969_vm3 = vcmp.gt.f32.partialorder %v506_v36, %v472_v50 }
  0xb4   : > { %v605_v31 = vmul.f32 %v604_v61, %v602_v19  ;;  %v639_v26 = vsub.f32 %v636_v52, %v632_v38  ;;  %v508_v34 = vsel %vm1969_vm3, %v506_v36, %v472_v50  ;;  %v401_v38 = vsel %vm399_vm0, %v377_v6, 0.0  ;;  %s2346_s19 = scalar_lea.vmem [#allocation6], %s2345_s5  ;;  %s340_s20 = scalar_lea.vmem [#allocation10], %s2345_s5 }
  0xb5   : > { %v645_v58 = vstv %s644_s7  ;;  %v638_v19 = vmax.f32 %v637_v41, 0.0  ;;  %v404_v36 = vsel %vm399_vm0, %v383_v12, 0.0  ;;  %s870_s10 = sshll.u32 %s340_s20, 4  ;;  %s849_s22 = scalar_lea.sflag [#allocation4], %s2347_s30  ;;  %s2160_s10 = int_to_ptr.vmem [resolvable:$true] %s870_s10 }
  0xb6   : > { %v611_v60 = vsub.f32 %v610_v39, %v605_v31  ;;  %v640_v61 = vmax.f32 %v639_v26, 0.0  ;;  %v646_v30 = vadd.f32 %v645_v58, %v1706_v13  ;;  %v402_v13 = vsel %vm399_vm0, %v379_v8, 0.0  ;;  %s1318_s21 = scalar_lea.vmem %s2160_s10, 128 }
  0xb7   : > { %v403_v39 = vsel %vm399_vm0, %v381_v10, 0.0  ;;  %v437_v8 = vsel %vm1913_vm1, %v413_v15, %v401_v38  ;;  %v438_v10 = vsel %vm1913_vm1, %v415_v18, %v402_v13  ;;  %v440_v44 = vsel %vm1913_vm1, %v419_v25, %v404_v36  ;;  %p1319_p6 = scmp.ne.s32.totalorder %s2160_s10, %s1318_s21 }
  0xb8   : > { %v612_v2 = vmax.f32 %v611_v60, 1e-06  ;;  %v641_v27 = vmul.f32 %v640_v61, %v638_v19  ;;  %v439_v12 = vsel %vm1913_vm1, %v417_v21, %v403_v39  ;;  %v473_v18 = vsel %vm1948_vm2, %v449_v32, %v437_v8  ;;  %s2158_s12 = scalar_lea.hbm %s2349_s9, %s1642_s16  ;;  %s1450_s16 = smov [#allocation10]  }
  0xb9   : > { %v1202_v3 = vpop.eup %1201  ;;  %v474_v21 = vsel %vm1948_vm2, %v451_v35, %v438_v10  ;;  %v475_v25 = vsel %vm1948_vm2, %v453_v43, %v439_v12  ;;  %v476_v58 = vsel %vm1948_vm2, %v455_v45, %v440_v44  ;;  %v509_v32 = vsel %vm1969_vm3, %v485_v48, %v473_v18  ;;  %p1320_p8 = pnand %p1319_p6, %p1574_p12  ;;  %s1322_s2 = sshll.u32 %s1450_s16, 4  ;;  %s1323_s2 = int_to_ptr.vmem [resolvable:$false] %s1322_s2 }
  0xba   : > { %v1204_v56 = vpop.eup %1203  ;;  %v542_v24 = vmul.f32 %v1202_v3, %v1895_v63  ;;  %1207 = vrcp.f32 %v612_v2  ;;  %v647_v63 = vsub.f32 %v646_v30, %v641_v27  ;;  %v510_v35 = vsel %vm1969_vm3, %v487_v51, %v474_v21  ;;  %s1324_s11 = scalar_lea.vmem %s1323_s2, 256  ;;  %p1325_p3 = scmp.lt.s32.totalorder %s2160_s10, %s1323_s2 }
  0xbb   : > { %v714_v46 = vadd.f32 1.0, %v1204_v56  ;;  %v511_v43 = vsel %vm1969_vm3, %v489_v55, %v475_v25  ;;  %v512_v45 = vsel %vm1969_vm3, %v491_v59, %v476_v58  ;;  %v663_v26 = vlaneseq  ;;  %p1321_p9 = pneg %p1320_p8  ;;  %p1326_p7 = scmp.lt.s32.totalorder %s1324_s11, %s1318_s21 }
  0xbc   : > { %vm1993_vm4 = vcmp.gt.f32.partialorder %v542_v24, %v508_v34  ;;  %v648_v50 = vmax.f32 %v647_v63, 1e-06  ;;  %v362_v2 = vmul.f32 0.5, %v1673_v4  ;;  %v364_v19 = vmul.f32 0.5, %v1677_v5 }
  0xbd   : > { %v544_v15 = vsel %vm1993_vm4, %v542_v24, %v508_v34  ;;  %v545_v51 = vsel %vm1993_vm4, %v521_v11, %v509_v32  ;;  %v546_v7 = vsel %vm1993_vm4, %v523_v17, %v510_v35  ;;  %v547_v55 = vsel %vm1993_vm4, %v525_v28, %v511_v43  ;;  %p1327_p10 = por %p1326_p7, %p1325_p3 }
  0xbe   : > { %1209 = vrcp.f32 %v648_v50  ;;  %v548_v59 = vsel %vm1993_vm4, %v527_v33, %v512_v45  ;;  %v677_v11 = vcombine.high %v1846_v29, %v1846_v29  ;;  %v1446_v61 = vmov 286326784  }
  0xbf   : > { %v1206_v52 = vpop.eup %1205  ;;  %1211 = vlog2.f32 %v714_v46  ;;  %v749_v30 = vunpack.c.l.s4 %v1446_v61  ;;  %v2099_v56 = vshrl.u32 %v663_v26, 7  ;;  %v365_v36 = vadd.f32 %v364_v19, %v1656_v1  ;;  %p1328_p13 = pnand %p1327_p10, %p1321_p9 }
  0xc0   : > { %v578_v23 = vmul.f32 %v1206_v52, %v569_v57  ;;  %1213 = vrcp.f32 %v1673_v4  ;;  %v1447_v1 = vmov 0   ;;  %v1448_v52 = vmov 0.0  }
  0xc1   : > { %1215 = vrcp.f32 %v1677_v5  ;;  %v665_v13 = vsub.s32 0, %v2099_v56  ;;  %v669_v39 = vsub.s32 1, %v2099_v56 }
  0xc2   : > { %vm2031_vm5 = vcmp.gt.f32.partialorder %v578_v23, %v544_v15 }
  0xc3   : > { %v580_v48 = vsel %vm2031_vm5, %v578_v23, %v544_v15  ;;  %v581_v17 = vsel %vm2031_vm5, %v557_v37, %v545_v51  ;;  %v582_v28 = vsel %vm2031_vm5, %v559_v49, %v546_v7  ;;  %v583_v33 = vsel %vm2031_vm5, %v561_v53, %v547_v55 }
  0xc4   : > { %v584_v37 = vsel %vm2031_vm5, %v563_v54, %v548_v59  ;;  %v696_v53 = vmax.f32 %v1846_v29, 0.0 }
  0xc7   : > { %v1208_v57 = vpop.eup %1207 }
  0xc8   : > { %v614_v41 = vmul.f32 %v1208_v57, %v605_v31  ;;  %v662_v31 = vsub.f32 1.0, %v1846_v29 }
  0xca   : > { %vm2071_vm6 = vcmp.gt.f32.partialorder %v614_v41, %v580_v48  ;;  %v674_v63 = vcombine.high %v662_v31, %v662_v31 }
  0xcb   : > { %v1210_v3 = vpop.eup %1209  ;;  %v616_v49 = vsel %vm2071_vm6, %v614_v41, %v580_v48  ;;  %v617_v5 = vsel %vm2071_vm6, %v593_v20, %v581_v17  ;;  %v618_v54 = vsel %vm2071_vm6, %v595_v22, %v582_v28  ;;  %v619_v24 = vsel %vm2071_vm6, %v597_v40, %v583_v33 }
  0xcc   : > { %v1212_v4 = vpop.eup %1211  ;;  %v650_v34 = vmul.f32 %v1210_v3, %v641_v27  ;;  %v620_v38 = vsel %vm2071_vm6, %v599_v42, %v584_v37  ;;  %v363_v20 = vadd.f32 %v362_v2, %v1651_v0  ;;  %v750_v22 = vunpack.c.0.s8 %v749_v30 }
  0xcd   : > { %v1214_v50 = vpop.eup %1213  ;;  %v716_v10 = vmul.f32 0.6931472, %v1212_v4 }
  0xce   : > { %vm651_vm7 = vcmp.gt.f32.partialorder %v650_v34, %v616_v49  ;;  %v1216_v12 = vpop.eup %1215 }
  0xcf   : > { %v652_v46 = vsel %vm651_vm7, %v650_v34, %v616_v49  ;;  %v653_v6 = vsel %vm651_vm7, %v629_v14, %v617_v5  ;;  %v654_v40 = vsel %vm651_vm7, %v631_v16, %v618_v54  ;;  %v655_v27 = vsel %vm651_vm7, %v633_v62, %v619_v24 }
  0xd0   : > { %v656_v42 = vsel %vm651_vm7, %v635_v47, %v620_v38  ;;  %vm2130_vm8 = vcmp.gt.f32.partialorder %v652_v46, 0.5  ;;  %v729_v0 = vsub.f32 %v655_v27, %v653_v6  ;;  %v1449_v16 = vmov 0.75  }
  0xd1   : > { %v659_v44 = vsel %vm2130_vm8, 1, %v1447_v1  ;;  %v1074_v14 = vsel %vm2130_vm8, 1.0, %v1448_v52  ;;  %v661_v62 = vsel %vm2130_vm8, 0.25, %v1449_v16  ;;  %v730_v47 = vsub.f32 %v656_v42, %v654_v40 }
  0xd2   : > { %v666_v15 = vrot.slane %v659_v44, %v665_v13  ;;  %v670_v18 = vrot.slane %v659_v44, %v669_v39  ;;  %v687_v21 = vrot.slane %v661_v62, %v665_v13  ;;  %v691_v25 = vrot.slane %v661_v62, %v669_v39 }
  0xd3   : > { %v701_v23 = vrot.slane %v1074_v14, %v665_v13  ;;  %v705_v58 = vrot.slane %v1074_v14, %v669_v39  ;;  %v731_v60 = vmul.f32 0.5, %v729_v0  ;;  %v733_v32 = vmul.f32 0.5, %v730_v47 }
  0xd4   : > { %vm671_vm9 = vcmp.eq.s32.totalorder %v666_v15, 1  ;;  %vm672_vm10 = vcmp.eq.s32.totalorder %v670_v18, 1  ;;  %v739_v35 = vmul.f32 %v1214_v50, %v729_v0  ;;  %v743_v43 = vmul.f32 %v1216_v12, %v730_v47 }
  0xd5   : > { %v679_v45 = vsel %vm671_vm9, %v662_v31, %v1846_v29  ;;  %v680_v57 = vsel %vm672_vm10, %v674_v63, %v677_v11  ;;  %v706_v48 = vcombine.low %v701_v23, %v705_v58  ;;  %v732_v51 = vadd.f32 %v731_v60, %v653_v6 }
  0xd6   : > { %v681_v7 = vmul.f32 %v679_v45, %v679_v45  ;;  %v682_v55 = vmul.f32 %v680_v57, %v680_v57  ;;  %v734_v41 = vadd.f32 %v733_v32, %v654_v40  ;;  %v740_v59 = vsel %vm2130_vm8, %v739_v35, 1.0 }
  0xd7   : > { %v708_v9 = vmul.f32 %v706_v48, %v1846_v29  ;;  %v735_v17 = vsub.f32 %v732_v51, %v363_v20  ;;  %1217 = vlog2.f32 %v740_v59  ;;  %v744_v28 = vsel %vm2130_vm8, %v743_v43, 1.0  ;;  %v728_v29 = vld [vmem:[%s2346_s19] sm:$0xff] }
  0xd8   : > { %v737_v33 = vsub.f32 %v734_v41, %v365_v36  ;;  %1219 = vlog2.f32 %v744_v28  ;;  %v2147_v11 = vsub.s32 %v750_v22, %v2099_v56  ;;  %v694_v31 = vmul.f32 %v687_v21, %v681_v7 }
  0xd9   : > { %v709_v2 = vsub.f32 %v696_v53, %v708_v9  ;;  %v736_v19 = vmul.f32 %v1214_v50, %v735_v17  ;;  %v695_v61 = vmul.f32 %v691_v25, %v682_v55 }
  0xda   : > { %v738_v37 = vmul.f32 %v1216_v12, %v737_v33 }
  0xdb   : > { %v717_v30 = vadd.f32 %v716_v10, %v709_v2  ;;  %v754_v3 = vrot.slane %v736_v19, %v2147_v11 }
  0xdc   : > { %v770_v49 = vrot.slane %v738_v37, %v2147_v11 }
  0xdd   : > { %v719_v4 = vcombine.high %v717_v30, %v717_v30  ;;  %v721_v5 = vmul.f32 %v717_v30, %v694_v31  ;;  %v756_v34 = vsub.f32 %v728_v29, %v754_v3 }
  0xde   : > { %v772_v54 = vsub.f32 %v728_v29, %v770_v49 }
  0xdf   : > { %v722_v24 = vmul.f32 %v719_v4, %v695_v61  ;;  %v757_v39 = vand.u32 2147483647, %v756_v34  ;;  %v759_v63 = vmul.f32 0.5, %v756_v34 }
  0xe0   : > { %v773_v53 = vand.u32 2147483647, %v772_v54  ;;  %v775_v38 = vmul.f32 0.5, %v772_v54 }
  0xe1   : > { %v725_v13 = vcombine.low %v721_v5, %v722_v24 }
  0xe2   : > { %v776_v20 = vmul.f32 %v775_v38, %v772_v54  ;;  %v1076_v36 = vadd.f32 -0.5, %v773_v53  ;;  %vm2162_vm11 = vcmp.lt.f32.partialorder %v773_v53, 1.0 }
  0xe3   : > { %727 = vst [vmem:[%s340_s20] sm:$0xff] %v725_v13 }
  0xe4   : > { %v1218_v22 = vpop.eup %1217 }
  0xe5   : > { %1331 = shalt.err (!%p1328_p13)
}
  0xe6   : > { %s1332_s18 = scalar_lea.hbm %s2158_s12, 128  ;;  %s1336_s14 = scalar_lea.hbm %s2349_s9, 256 }
  0xe7   : > { %p1333_p0 = scmp.ne.s32.totalorder %s2158_s12, %s1332_s18  ;;  %p1337_p1 = scmp.lt.s32.totalorder %s2158_s12, %s2349_s9 }
  0xe8   : > { %p1338_p2 = scmp.lt.s32.totalorder %s1336_s14, %s1332_s18 }
  0xe9   : > { %p1334_p5 = pnand %p1333_p0, %p1574_p12 }
  0xea   : > { %p1339_p4 = por %p1338_p2, %p1337_p1 }
  0xeb   : > { %p1335_p11 = pneg %p1334_p5 }
  0xed   : > { %p1340_p6 = pnand %p1339_p4, %p1335_p11 }
  0xef   : > { %1343 = shalt.err (!%p1340_p6)
}
  0xf0   : > { %1106 = dma.vmem_to_hbm [thread:$0]  (%p1574_p12), %s2160_s10, 128, %s2158_s12, %s849_s22   ;;  %v1220_v6 = vpop.eup %1219  ;;  %v742_v40 = vmul.f32 0.6931472, %v1218_v22  ;;  %v760_v50 = vmul.f32 %v759_v63, %v756_v34  ;;  %v1075_v42 = vadd.f32 -0.5, %v757_v39  ;;  %v778_v10 = vsel %vm2162_vm11, %v776_v20, %v1076_v36 }
  0xf1   : > { %v746_v27 = vmul.f32 0.6931472, %v1220_v6  ;;  %vm2190_vm12 = vcmp.lt.f32.partialorder %v757_v39, 1.0  ;;  %v1451_v52 = vmov 1966171168   ;;  %v1077_v16 = vrot.slane %v778_v10, 9 }
  0xf2   : > { %v791_v0 = vrot.slane %v742_v40, %v2147_v11  ;;  %v828_v14 = vunpack.c.l.s4 %v1451_v52  ;;  %v762_v47 = vsel %vm2190_vm12, %v760_v50, %v1075_v42  ;;  %s2354_s4 = sld [smem:[#allocation22_spill]]  ;;  %s1072_s23 = sshll.u32 %s2347_s30, 1  ;;  %vm845_vm15 = vcmp.lt.s32.totalorder %v663_v26, 256 }
  0xf3   : > { %v812_v1 = vrot.slane %v746_v27, %v2147_v11  ;;  %v783_v32 = vadd.f32 %v1077_v16, %v762_v47  ;;  %s347_s26 = scalar_lea.vmem [#allocation11], %s1072_s23  ;;  %s2355_s8 = sld [smem:[#allocation43_spill]] }
  0xf4   : > { %v793_v44 = vsub.f32 %v728_v29, %v791_v0  ;;  %v829_v60 = vunpack.c.0.s8 %v828_v14  ;;  %s886_s29 = sshll.u32 %s347_s26, 4  ;;  %s854_s13 = scalar_lea.sflag [#allocation12], %s2347_s30  ;;  %s887_s29 = int_to_ptr.vmem [resolvable:$true] %s886_s29 }
  0xf5   : > { %v814_v62 = vsub.f32 %v728_v29, %v812_v1  ;;  %s1344_s5 = scalar_lea.vmem %s887_s29, 32  ;;  %s1452_s19 = smov [#allocation11]  }
  0xf6   : > { %v794_v15 = vand.u32 2147483647, %v793_v44  ;;  %v796_v18 = vmul.f32 0.5, %v793_v44  ;;  %v832_v55 = vsub.s32 %v829_v60, %v2099_v56  ;;  %p1345_p8 = scmp.ne.s32.totalorder %s887_s29, %s1344_s5  ;;  %s1348_s20 = sshll.u32 %s1452_s19, 4  ;;  %s1349_s20 = int_to_ptr.vmem [resolvable:$false] %s1348_s20 }
  0xf7   : > { %v815_v21 = vand.u32 2147483647, %v814_v62  ;;  %v817_v25 = vmul.f32 0.5, %v814_v62  ;;  %s1350_s10 = scalar_lea.vmem %s1349_s20, 64  ;;  %p1351_p7 = scmp.lt.s32.totalorder %s887_s29, %s1349_s20 }
  0xf8   : > { %vm795_vm13 = vcmp.lt.f32.partialorder %v794_v15, 1.0  ;;  %v797_v23 = vmul.f32 %v796_v18, %v793_v44  ;;  %v1078_v58 = vadd.f32 -0.5, %v794_v15  ;;  %s1093_s7 = sshll.u32 %s2354_s4, 5  ;;  %p1346_p9 = pnand %p1345_p8, %p1574_p12 }
  0xf9   : > { %vm816_vm14 = vcmp.lt.f32.partialorder %v815_v21, 1.0  ;;  %v818_v35 = vmul.f32 %v817_v25, %v814_v62  ;;  %v1080_v43 = vadd.f32 -0.5, %v815_v21  ;;  %s2204_s15 = scalar_lea.hbm %s2355_s8, %s1093_s7  ;;  %p1352_p10 = scmp.lt.s32.totalorder %s1350_s10, %s1344_s5 }
  0xfa   : > { %v799_v45 = vsel %vm795_vm13, %v797_v23, %v1078_v58  ;;  %p1347_p3 = pneg %p1346_p9 }
  0xfb   : > { %v1079_v57 = vrot.slane %v799_v45, 10  ;;  %v820_v48 = vsel %vm816_vm14, %v818_v35, %v1080_v43  ;;  %p1353_p13 = por %p1352_p10, %p1351_p7 }
  0xfc   : > { %v1081_v51 = vrot.slane %v820_v48, 11 }
  0xfd   : > { %v804_v7 = vadd.f32 %v1079_v57, %v783_v32  ;;  %p1354_p0 = pnand %p1353_p13, %p1347_p3 }
  0xff   : > { %v825_v41 = vadd.f32 %v1081_v51, %v804_v7 }
 0x101   : > { %v833_v59 = vrot.slane %v825_v41, %v832_v55 }
 0x103   : > { %v840_v9 = vrot.slane %v833_v59, %v832_v55 }
 0x105   : > { %v842_v17 = vsel %vm2130_vm8, %v840_v9, 0.0 }
 0x106   : > { %847 = vst.msk [vmem:[%s347_s26] sm:$0x3] %vm845_vm15, %v842_v17 }
 0x107   : > { %1357 = shalt.err (!%p1354_p0)
}
 0x108   : > { %s1358_s28 = scalar_lea.hbm %s2204_s15, 32  ;;  %s1362_s12 = scalar_lea.hbm %s2355_s8, 64 }
 0x109   : > { %p1359_p5 = scmp.ne.s32.totalorder %s2204_s15, %s1358_s28  ;;  %p1363_p2 = scmp.lt.s32.totalorder %s2204_s15, %s2355_s8 }
 0x10a   : > { %p1364_p4 = scmp.lt.s32.totalorder %s1362_s12, %s1358_s28 }
 0x10b   : > { %p1360_p11 = pnand %p1359_p5, %p1574_p12 }
 0x10c   : > { %p1365_p6 = por %p1364_p4, %p1363_p2 }
 0x10d   : > { %p1361_p1 = pneg %p1360_p11 }
 0x10f   : > { %p1366_p8 = pnand %p1365_p6, %p1361_p1 }
 0x111   : > { %1369 = shalt.err (!%p1366_p8)
}
 0x112   : > { %1107 = dma.vmem_to_hbm [thread:$0]  (%p1574_p12), %s887_s29, 32, %s2204_s15, %s854_s13  }
 0x113 PF: > { %s2356_s16 = sld [smem:[#allocation19_spill]] }
 0x114   : > { %s2357_s2 = sld [smem:[#allocation25_spill]] }
 0x115   : > { %s2358_s11 = sld [smem:[#allocation24_spill]] }
 0x119   : > { %s898_s18 = sand.u32 1, %s2356_s16  }
 0x11a   : > { %p2359_p9 = scmp.ne.s32.totalorder %s2357_s2, 0  ;;  %s899_s0 = scalar_lea.sflag [#allocation4], %s898_s18 }
 0x11b   : > { %p2360_p3 = scmp.ge.s32.totalorder %s2358_s11, 2 }
 0x11d   : > { %p1125_p7 = pnand %p2360_p3, %p2359_p9 }
 0x11f   : > { %p1126_p10 = pneg %p1125_p7 }
 0x121   : > { %1411 = dma.done.wait (%p1126_p10), %s899_s0, 128  }
 0x122   : > { %1413 = vsyncadd (%p1126_p10), %s899_s0, 4294967168  ;;  %s908_s17 = scalar_lea.sflag [#allocation12], %s898_s18 }
 0x123   : > { %1415 = dma.done.wait (%p1126_p10), %s908_s17, 32  }
 0x124   : > { %1417 = vsyncadd (%p1126_p10), %s908_s17, 4294967264  ;;  %s29_s23 = sadd.s32 1, %s2358_s11   ;;  %s2361_s18 = sld [smem:[#allocation20_spill]] }
 0x125   : > { %p26_p13 = scmp.ge.s32.totalorder %s29_s23, 4   ;;  %s2362_s19 = sld [smem:[#allocation21_spill]] }
 0x126   : > { %s2363_s20 = sld [smem:[#allocation28_spill]] }
 0x127   : > { %s2364_s21 = sld [smem:[#allocation23_spill]]  ;;  %28 = sbr.rel (!%p26_p13) target bundleno = 18 (0x12), region = 124 }
 0x128   : > { %s2365_s22 = sld [smem:[#allocation26_spill]] }
 0x12c   :  { %913 = vsyncpa [#allocation3], 1 }
 0x12d   :  { %915 = vsyncpa [#allocation3 + $0x1], 1 }
 0x12e   :  { %916 = vsyncpa [#allocation7], 1 }
 0x12f   :  { %918 = vsyncpa [#allocation7 + $0x1], 1 }
 0x130   :  { %919 = vsyncpa [#allocation4], 1 }
 0x131   :  { %921 = vsyncpa [#allocation4 + $0x1], 1 }
 0x132   :  { %922 = vsyncpa [#allocation12], 1 }
 0x133   :  { %924 = vsyncpa [#allocation12 + $0x1], 1 }
 0x134   :  { %925 = vsyncpa [#allocation5], 1 }
 0x135   :  { %927 = vsyncpa [#allocation5 + $0x1], 1 }

</bundles_post_ra>
